<compile_context>
chip_gen: v7x
topology: tpu7x:2x2x1
jax: 0.10.0
libtpu: 0.0.40
codegen_flags: <defaults>
</compile_context>

<pallas_src>
import jax
import jax.numpy as jnp
import numpy as np
from jax.experimental import pallas as pl
from jax.experimental.pallas import tpu as pltpu


# --------------------------- fused forward kernel ----------------------------
def lstm_net_kernel(xb_ref, wih_ref, whh_ref, b_ref, w1_ref, b1_ref, w2_ref, b2_ref,
                    o_ref, gx_ref):
    """Fused LSTM + Flatten + Linear/ReLU + Linear for one batch tile.

    xb_ref : (T*Bt, D)  bf16  time-major rows (row t*Bt + b  <->  (time t, batch b))
    wih_ref: (D, 4H)    bf16  input->hidden weights, gate cols i|f|g|o (g cols x2)
    whh_ref: (H, 4H)    bf16  hidden->hidden weights, same packing (g cols x2)
    b_ref  : (1, 4H)    f32   combined bias b_ih + b_hh (g section x2)
    w1_ref : (T, H, F)  bf16  FC1 weight with the flatten order (t, h) made explicit
    b1_ref : (1, F)     f32
    w2_ref : (F, C)     f32
    b2_ref : (1, C)     f32
    o_ref  : (Bt, C)    f32   output logits for this batch tile
    gx_ref : (T*Bt, 4H) f32   VMEM scratch: hoisted input projections (+ bias)
    """
    H = whh_ref.shape[0]
    F = w1_ref.shape[-1]
    Bt = o_ref.shape[0]
    T = xb_ref.shape[0] // Bt

    # Hoisted input projection: ONE MXU matmul covers all timesteps and all 4 gates,
    # bias folded in, written once to the lane-dense scratch (off the serial path).
    gx_ref[...] = (
        jnp.dot(xb_ref[...], wih_ref[...], preferred_element_type=jnp.float32)
        + b_ref[...]
    )

    whh = whh_ref[...]                          # (H, 4H) bf16, kept resident
    h = jnp.zeros((Bt, H), jnp.float32)
    c = jnp.zeros((Bt, H), jnp.float32)
    acc = jnp.zeros((Bt, F), jnp.float32)       # online FC1 accumulator (lane dense)

    # T is static & small: fully unrolled so every index is constant and the scheduler
    # can overlap MXU / EUP / VPU work of adjacent timesteps.
    for t in range(T):
        # One fused hidden matmul per step (1 MXU push/drain instead of 4).
        pre = gx_ref[pl.ds(t * Bt, Bt), :] + jnp.dot(
            h.astype(jnp.bfloat16), whh, preferred_element_type=jnp.float32)
        # One EUP push over the packed (Bt, 4H) tile; the g gate's pre-activation was
        # pre-scaled by 2 in the wrapper so tanh(x) = 2*sigmoid(2x) - 1.
        s = jax.nn.sigmoid(pre)
        i_g = s[:, 0 * H:1 * H]
        f_g = s[:, 1 * H:2 * H]
        g_g = 2.0 * s[:, 2 * H:3 * H] - 1.0
        o_g = s[:, 3 * H:4 * H]
        c = f_g * c + i_g * g_g
        h = o_g * jnp.tanh(c)
        # FC1 accumulated online: equivalent to flatten(hs) @ W1, no hs buffer needed.
        acc = acc + jnp.dot(h.astype(jnp.bfloat16), w1_ref[t],
                            preferred_element_type=jnp.float32)

    hid = jnp.maximum(acc + b1_ref[...], 0.0)   # FC1 bias + ReLU (Dropout = identity)
    o_ref[...] = (jnp.dot(hid, w2_ref[...], preferred_element_type=jnp.float32)
                  + b2_ref[...])


# ------------------------------ wrapper -------------------------------------
def lstm_net_forward(input_data, params):
    """input_data: (B, T, D) float32, batch_first like PyTorch. Returns (B, n_classes)."""
    B, T, D = input_data.shape
    H = params["whh"].shape[0]
    F = params["w1"].shape[-1]
    C = params["w2"].shape[-1]

    # Batch tile: whole batch (padded to the 8-sublane multiple) if small, else 128-row
    # tiles sharded over a parallel grid (uses both TensorCores on v7x).
    bt = 128 if B > 128 else ((B + 7) // 8) * 8
    Bp = ((B + bt - 1) // bt) * bt
    x = input_data
    if Bp != B:
        x = jnp.pad(x, ((0, Bp - B), (0, 0), (0, 0)))
    nb = Bp // bt

    # Per-tile, time-major flattened rows: row t*bt + b of tile j is (batch j*bt+b, time t).
    # All layout plumbing lives here in the wrapper; the kernel never reshapes.
    x_tm = jnp.transpose(x, (1, 0, 2)).reshape(T, nb, bt, D)
    x_tm = jnp.transpose(x_tm, (1, 0, 2, 3)).reshape(nb, T * bt, D).astype(jnp.bfloat16)

    # Packed gate weights (columns i|f|g|o); fold a factor 2 into the g gate so the
    # kernel can use one sigmoid for all 4 gates (tanh(x) = 2*sigmoid(2x) - 1).
    gsc = jnp.concatenate(
        [jnp.ones((1, 2 * H), jnp.float32),
         jnp.full((1, H), 2.0, jnp.float32),
         jnp.ones((1, H), jnp.float32)], axis=1)
    wih_p = (params["wih"] * gsc).astype(jnp.bfloat16)         # (D, 4H)
    whh_p = (params["whh"] * gsc).astype(jnp.bfloat16)         # (H, 4H)
    b_p = (params["b_lstm"] * gsc).astype(jnp.float32)         # (1, 4H)
    w1t = params["w1"].reshape(T, H, F).astype(jnp.bfloat16)   # (T, H, F)

    out = pl.pallas_call(
        lstm_net_kernel,
        out_shape=jax.ShapeDtypeStruct((Bp, C), jnp.float32),
        grid=(nb,),
        in_specs=[
            pl.BlockSpec((None, T * bt, D), lambda j: (j, 0, 0)),   # x: one batch tile
            pl.BlockSpec((D, 4 * H), lambda j: (0, 0)),             # wih (packed gates)
            pl.BlockSpec((H, 4 * H), lambda j: (0, 0)),             # whh (packed gates)
            pl.BlockSpec((1, 4 * H), lambda j: (0, 0)),             # lstm bias
            pl.BlockSpec((T, H, F), lambda j: (0, 0, 0)),           # FC1 weight
            pl.BlockSpec((1, F), lambda j: (0, 0)),                 # FC1 bias
            pl.BlockSpec((F, C), lambda j: (0, 0)),                 # FC2 weight
            pl.BlockSpec((1, C), lambda j: (0, 0)),                 # FC2 bias
        ],
        out_specs=pl.BlockSpec((bt, C), lambda j: (j, 0)),
        scratch_shapes=[pltpu.VMEM((T * bt, 4 * H), jnp.float32)],
        compiler_params=pltpu.CompilerParams(dimension_semantics=("parallel",)),
    )(x_tm, wih_p, whh_p, b_p, w1t, params["b1"], params["w2"], params["b2"])
    return out[:B]


# --------------------------- pure-JAX reference ------------------------------
def lstm_net_reference(input_data, params):
    B, T, D = input_data.shape
    H = params["whh"].shape[0]
    h = jnp.zeros((B, H), jnp.float32)
    c = jnp.zeros((B, H), jnp.float32)
    hs = []
    for t in range(T):
        gates = input_data[:, t, :] @ params["wih"] + h @ params["whh"] + params["b_lstm"]
        i_g = jax.nn.sigmoid(gates[:, 0 * H:1 * H])
        f_g = jax.nn.sigmoid(gates[:, 1 * H:2 * H])
        g_g = jnp.tanh(gates[:, 2 * H:3 * H])
        o_g = jax.nn.sigmoid(gates[:, 3 * H:4 * H])
        c = f_g * c + i_g * g_g
        h = o_g * jnp.tanh(c)
        hs.append(h)
    x = jnp.stack(hs, axis=1).reshape(B, T * H)
    x = jnp.maximum(x @ params["w1"] + params["b1"], 0.0)
    return x @ params["w2"] + params["b2"]


# ------------------------------ param init ----------------------------------
def init_params(key, input_dim, hidden_dim, time_length, fc_dim=128, n_classes=12):
    ks = jax.random.split(key, 7)
    s = 1.0 / np.sqrt(hidden_dim)
    # PyTorch stores weight_ih (4H, D) / weight_hh (4H, H); we keep transposed copies.
    wih = jax.random.uniform(ks[0], (input_dim, 4 * hidden_dim), jnp.float32, -s, s)
    whh = jax.random.uniform(ks[1], (hidden_dim, 4 * hidden_dim), jnp.float32, -s, s)
    b_lstm = jax.random.uniform(ks[2], (1, 4 * hidden_dim), jnp.float32, -s, s)  # b_ih + b_hh
    s1 = 1.0 / np.sqrt(time_length * hidden_dim)
    w1 = jax.random.uniform(ks[3], (time_length * hidden_dim, fc_dim), jnp.float32, -s1, s1)
    b1 = jax.random.uniform(ks[4], (1, fc_dim), jnp.float32, -s1, s1)
    s2 = 1.0 / np.sqrt(fc_dim)
    w2 = jax.random.uniform(ks[5], (fc_dim, n_classes), jnp.float32, -s2, s2)
    b2 = jax.random.uniform(ks[6], (1, n_classes), jnp.float32, -s2, s2)
    return dict(wih=wih, whh=whh, b_lstm=b_lstm, w1=w1, b1=b1, w2=w2, b2=b2)


if __name__ == "__main__":
    # Small shapes consistent with the module: LSTM_NET(input_dim=8, hidden_dim=16, time_length=16)
    B, T, D, H = 8, 16, 8, 16
    key = jax.random.PRNGKey(0)
    k_in, k_p = jax.random.split(key)
    x = jax.random.normal(k_in, (B, T, D), jnp.float32)
    params = init_params(k_p, input_dim=D, hidden_dim=H, time_length=T)

    fwd = jax.jit(lstm_net_forward)
    out = jax.block_until_ready(fwd(x, params))
    ref = jax.block_until_ready(lstm_net_reference(x, params))

    assert out.shape == (B, 12), out.shape
    # bf16 MXU operands -> tolerance loosened vs. the pure-f32 reference.
    np.testing.assert_allclose(np.asarray(out), np.asarray(ref), rtol=3e-2, atol=3e-2)
    print("KERNEL_OK")
</pallas_src>

<mosaic_0001>
module attributes {stable_mosaic.version = 11 : i64} {
  func.func @lstm_net_kernel(%arg0: i32, %arg1: memref<1x128x8xbf16, #tpu.memory_space<vmem>>, %arg2: memref<8x64xbf16, #tpu.memory_space<vmem>>, %arg3: memref<16x64xbf16, #tpu.memory_space<vmem>>, %arg4: memref<1x64xf32, #tpu.memory_space<vmem>>, %arg5: memref<16x16x128xbf16, #tpu.memory_space<vmem>>, %arg6: memref<1x128xf32, #tpu.memory_space<vmem>>, %arg7: memref<128x12xf32, #tpu.memory_space<vmem>>, %arg8: memref<1x12xf32, #tpu.memory_space<vmem>>, %arg9: memref<8x12xf32, #tpu.memory_space<vmem>>, %arg10: memref<128x64xf32, #tpu.memory_space<vmem>>) attributes {dimension_semantics = [#tpu.dimension_semantics<parallel>], iteration_bounds = array<i64: 1>, scalar_prefetch = 0 : i64, scratch_operands = 1 : i64, tpu.core_type = #tpu.core_type<tc>, window_params = [{transform_indices = @transform_0, window_bounds = array<i64: 1, 128, 8>}, {pipeline_mode = #tpu.pipeline_mode<synchronous>, transform_indices = @transform_1, window_bounds = array<i64: 8, 64>}, {pipeline_mode = #tpu.pipeline_mode<synchronous>, transform_indices = @transform_2, window_bounds = array<i64: 16, 64>}, {pipeline_mode = #tpu.pipeline_mode<synchronous>, transform_indices = @transform_3, window_bounds = array<i64: 1, 64>}, {pipeline_mode = #tpu.pipeline_mode<synchronous>, transform_indices = @transform_4, window_bounds = array<i64: 16, 16, 128>}, {pipeline_mode = #tpu.pipeline_mode<synchronous>, transform_indices = @transform_5, window_bounds = array<i64: 1, 128>}, {pipeline_mode = #tpu.pipeline_mode<synchronous>, transform_indices = @transform_6, window_bounds = array<i64: 128, 12>}, {pipeline_mode = #tpu.pipeline_mode<synchronous>, transform_indices = @transform_7, window_bounds = array<i64: 1, 12>}, {transform_indices = @transform_8, window_bounds = array<i64: 8, 12>}]} {
    %c0 = arith.constant 0 : index
    %c0_0 = arith.constant 0 : index
    %c0_1 = arith.constant 0 : index
    %0 = vector.load %arg1[%c0, %c0_0, %c0_1] : memref<1x128x8xbf16, #tpu.memory_space<vmem>>, vector<1x128x8xbf16>
    %1 = vector.shape_cast %0 : vector<1x128x8xbf16> to vector<128x8xbf16>
    %c0_2 = arith.constant 0 : index
    %c0_3 = arith.constant 0 : index
    %2 = vector.load %arg2[%c0_2, %c0_3] : memref<8x64xbf16, #tpu.memory_space<vmem>>, vector<8x64xbf16>
    %cst = arith.constant dense<0.000000e+00> : vector<128x64xf32>
    %3 = tpu.matmul %1, %2, %cst {dimension_numbers = #tpu.dot_dimension_numbers<[1], [0], [0], [1], [0, 0, 1, 1], [], []>} : vector<128x8xbf16>, vector<8x64xbf16>, vector<128x64xf32> -> vector<128x64xf32>
    %c0_4 = arith.constant 0 : index
    %c0_5 = arith.constant 0 : index
    %4 = vector.load %arg4[%c0_4, %c0_5] : memref<1x64xf32, #tpu.memory_space<vmem>>, vector<1x64xf32>
    %5 = vector.broadcast %4 : vector<1x64xf32> to vector<128x64xf32>
    %6 = arith.addf %3, %5 : vector<128x64xf32>
    %c0_6 = arith.constant 0 : index
    %c0_7 = arith.constant 0 : index
    %7 = vector.load %arg10[%c0_6, %c0_7] : memref<128x64xf32, #tpu.memory_space<vmem>>, vector<128x64xf32>
    tpu.vector_store %arg10[%c0_6, %c0_7], %6 {strides = array<i32>} : memref<128x64xf32, #tpu.memory_space<vmem>>, vector<128x64xf32>,
    %c0_8 = arith.constant 0 : index
    %c0_9 = arith.constant 0 : index
    %8 = vector.load %arg3[%c0_8, %c0_9] : memref<16x64xbf16, #tpu.memory_space<vmem>>, vector<16x64xbf16>
    %cst_10 = arith.constant 0.000000e+00 : f32
    %9 = vector.broadcast %cst_10 : f32 to vector<8x16xf32>
    %cst_11 = arith.constant 0.000000e+00 : f32
    %10 = vector.broadcast %cst_11 : f32 to vector<8x16xf32>
    %cst_12 = arith.constant 0.000000e+00 : f32
    %11 = vector.broadcast %cst_12 : f32 to vector<8x128xf32>
    %c0_13 = arith.constant 0 : index
    %c0_14 = arith.constant 0 : index
    %12 = vector.load %arg10[%c0_13, %c0_14] : memref<128x64xf32, #tpu.memory_space<vmem>>, vector<8x64xf32>
    %13 = arith.truncf %9 : vector<8x16xf32> to vector<8x16xbf16>
    %cst_15 = arith.constant dense<0.000000e+00> : vector<8x64xf32>
    %14 = tpu.matmul %13, %8, %cst_15 {dimension_numbers = #tpu.dot_dimension_numbers<[1], [0], [0], [1], [0, 0, 1, 1], [], []>} : vector<8x16xbf16>, vector<16x64xbf16>, vector<8x64xf32> -> vector<8x64xf32>
    %15 = arith.addf %12, %14 : vector<8x64xf32>
    %16 = arith.negf %15 : vector<8x64xf32>
    %17 = math.exp %16 : vector<8x64xf32>
    %cst_16 = arith.constant 1.000000e+00 : f32
    %18 = vector.broadcast %cst_16 : f32 to vector<8x64xf32>
    %19 = arith.addf %18, %17 : vector<8x64xf32>
    %20 = arith.divf %18, %19 : vector<8x64xf32>
    %21 = vector.extract_strided_slice %20 {offsets = [0, 0], sizes = [8, 16], strides = [1, 1]} : vector<8x64xf32> to vector<8x16xf32>
    %22 = vector.extract_strided_slice %20 {offsets = [0, 16], sizes = [8, 16], strides = [1, 1]} : vector<8x64xf32> to vector<8x16xf32>
    %23 = vector.extract_strided_slice %20 {offsets = [0, 32], sizes = [8, 16], strides = [1, 1]} : vector<8x64xf32> to vector<8x16xf32>
    %cst_17 = arith.constant 2.000000e+00 : f32
    %24 = vector.broadcast %cst_17 : f32 to vector<8x16xf32>
    %25 = arith.mulf %24, %23 : vector<8x16xf32>
    %cst_18 = arith.constant 1.000000e+00 : f32
    %26 = vector.broadcast %cst_18 : f32 to vector<8x16xf32>
    %27 = arith.subf %25, %26 : vector<8x16xf32>
    %28 = vector.extract_strided_slice %20 {offsets = [0, 48], sizes = [8, 16], strides = [1, 1]} : vector<8x64xf32> to vector<8x16xf32>
    %29 = arith.mulf %22, %10 : vector<8x16xf32>
    %30 = arith.mulf %21, %27 : vector<8x16xf32>
    %31 = arith.addf %29, %30 : vector<8x16xf32>
    %32 = math.tanh %31 : vector<8x16xf32>
    %33 = arith.mulf %28, %32 : vector<8x16xf32>
    %34 = arith.truncf %33 : vector<8x16xf32> to vector<8x16xbf16>
    %c0_19 = arith.constant 0 : index
    %c0_20 = arith.constant 0 : index
    %c0_21 = arith.constant 0 : index
    %35 = vector.load %arg5[%c0_19, %c0_20, %c0_21] : memref<16x16x128xbf16, #tpu.memory_space<vmem>>, vector<1x16x128xbf16>
    %36 = vector.shape_cast %35 : vector<1x16x128xbf16> to vector<16x128xbf16>
    %cst_22 = arith.constant dense<0.000000e+00> : vector<8x128xf32>
    %37 = tpu.matmul %34, %36, %cst_22 {dimension_numbers = #tpu.dot_dimension_numbers<[1], [0], [0], [1], [0, 0, 1, 1], [], []>} : vector<8x16xbf16>, vector<16x128xbf16>, vector<8x128xf32> -> vector<8x128xf32>
    %38 = arith.addf %11, %37 : vector<8x128xf32>
    %c8 = arith.constant 8 : index
    %c0_23 = arith.constant 0 : index
    %39 = vector.load %arg10[%c8, %c0_23] : memref<128x64xf32, #tpu.memory_space<vmem>>, vector<8x64xf32>
    %40 = arith.truncf %33 : vector<8x16xf32> to vector<8x16xbf16>
    %cst_24 = arith.constant dense<0.000000e+00> : vector<8x64xf32>
    %41 = tpu.matmul %40, %8, %cst_24 {dimension_numbers = #tpu.dot_dimension_numbers<[1], [0], [0], [1], [0, 0, 1, 1], [], []>} : vector<8x16xbf16>, vector<16x64xbf16>, vector<8x64xf32> -> vector<8x64xf32>
    %42 = arith.addf %39, %41 : vector<8x64xf32>
    %43 = arith.negf %42 : vector<8x64xf32>
    %44 = math.exp %43 : vector<8x64xf32>
    %cst_25 = arith.constant 1.000000e+00 : f32
    %45 = vector.broadcast %cst_25 : f32 to vector<8x64xf32>
    %46 = arith.addf %45, %44 : vector<8x64xf32>
    %47 = arith.divf %45, %46 : vector<8x64xf32>
    %48 = vector.extract_strided_slice %47 {offsets = [0, 0], sizes = [8, 16], strides = [1, 1]} : vector<8x64xf32> to vector<8x16xf32>
    %49 = vector.extract_strided_slice %47 {offsets = [0, 16], sizes = [8, 16], strides = [1, 1]} : vector<8x64xf32> to vector<8x16xf32>
    %50 = vector.extract_strided_slice %47 {offsets = [0, 32], sizes = [8, 16], strides = [1, 1]} : vector<8x64xf32> to vector<8x16xf32>
    %cst_26 = arith.constant 2.000000e+00 : f32
    %51 = vector.broadcast %cst_26 : f32 to vector<8x16xf32>
    %52 = arith.mulf %51, %50 : vector<8x16xf32>
    %cst_27 = arith.constant 1.000000e+00 : f32
    %53 = vector.broadcast %cst_27 : f32 to vector<8x16xf32>
    %54 = arith.subf %52, %53 : vector<8x16xf32>
    %55 = vector.extract_strided_slice %47 {offsets = [0, 48], sizes = [8, 16], strides = [1, 1]} : vector<8x64xf32> to vector<8x16xf32>
    %56 = arith.mulf %49, %31 : vector<8x16xf32>
    %57 = arith.mulf %48, %54 : vector<8x16xf32>
    %58 = arith.addf %56, %57 : vector<8x16xf32>
    %59 = math.tanh %58 : vector<8x16xf32>
    %60 = arith.mulf %55, %59 : vector<8x16xf32>
    %61 = arith.truncf %60 : vector<8x16xf32> to vector<8x16xbf16>
    %c1 = arith.constant 1 : index
    %c0_28 = arith.constant 0 : index
    %c0_29 = arith.constant 0 : index
    %62 = vector.load %arg5[%c1, %c0_28, %c0_29] : memref<16x16x128xbf16, #tpu.memory_space<vmem>>, vector<1x16x128xbf16>
    %63 = vector.shape_cast %62 : vector<1x16x128xbf16> to vector<16x128xbf16>
    %cst_30 = arith.constant dense<0.000000e+00> : vector<8x128xf32>
    %64 = tpu.matmul %61, %63, %cst_30 {dimension_numbers = #tpu.dot_dimension_numbers<[1], [0], [0], [1], [0, 0, 1, 1], [], []>} : vector<8x16xbf16>, vector<16x128xbf16>, vector<8x128xf32> -> vector<8x128xf32>
    %65 = arith.addf %38, %64 : vector<8x128xf32>
    %c16 = arith.constant 16 : index
    %c0_31 = arith.constant 0 : index
    %66 = vector.load %arg10[%c16, %c0_31] : memref<128x64xf32, #tpu.memory_space<vmem>>, vector<8x64xf32>
    %67 = arith.truncf %60 : vector<8x16xf32> to vector<8x16xbf16>
    %cst_32 = arith.constant dense<0.000000e+00> : vector<8x64xf32>
    %68 = tpu.matmul %67, %8, %cst_32 {dimension_numbers = #tpu.dot_dimension_numbers<[1], [0], [0], [1], [0, 0, 1, 1], [], []>} : vector<8x16xbf16>, vector<16x64xbf16>, vector<8x64xf32> -> vector<8x64xf32>
    %69 = arith.addf %66, %68 : vector<8x64xf32>
    %70 = arith.negf %69 : vector<8x64xf32>
    %71 = math.exp %70 : vector<8x64xf32>
    %cst_33 = arith.constant 1.000000e+00 : f32
    %72 = vector.broadcast %cst_33 : f32 to vector<8x64xf32>
    %73 = arith.addf %72, %71 : vector<8x64xf32>
    %74 = arith.divf %72, %73 : vector<8x64xf32>
    %75 = vector.extract_strided_slice %74 {offsets = [0, 0], sizes = [8, 16], strides = [1, 1]} : vector<8x64xf32> to vector<8x16xf32>
    %76 = vector.extract_strided_slice %74 {offsets = [0, 16], sizes = [8, 16], strides = [1, 1]} : vector<8x64xf32> to vector<8x16xf32>
    %77 = vector.extract_strided_slice %74 {offsets = [0, 32], sizes = [8, 16], strides = [1, 1]} : vector<8x64xf32> to vector<8x16xf32>
    %cst_34 = arith.constant 2.000000e+00 : f32
    %78 = vector.broadcast %cst_34 : f32 to vector<8x16xf32>
    %79 = arith.mulf %78, %77 : vector<8x16xf32>
    %cst_35 = arith.constant 1.000000e+00 : f32
    %80 = vector.broadcast %cst_35 : f32 to vector<8x16xf32>
    %81 = arith.subf %79, %80 : vector<8x16xf32>
    %82 = vector.extract_strided_slice %74 {offsets = [0, 48], sizes = [8, 16], strides = [1, 1]} : vector<8x64xf32> to vector<8x16xf32>
    %83 = arith.mulf %76, %58 : vector<8x16xf32>
    %84 = arith.mulf %75, %81 : vector<8x16xf32>
    %85 = arith.addf %83, %84 : vector<8x16xf32>
    %86 = math.tanh %85 : vector<8x16xf32>
    %87 = arith.mulf %82, %86 : vector<8x16xf32>
    %88 = arith.truncf %87 : vector<8x16xf32> to vector<8x16xbf16>
    %c2 = arith.constant 2 : index
    %c0_36 = arith.constant 0 : index
    %c0_37 = arith.constant 0 : index
    %89 = vector.load %arg5[%c2, %c0_36, %c0_37] : memref<16x16x128xbf16, #tpu.memory_space<vmem>>, vector<1x16x128xbf16>
    %90 = vector.shape_cast %89 : vector<1x16x128xbf16> to vector<16x128xbf16>
    %cst_38 = arith.constant dense<0.000000e+00> : vector<8x128xf32>
    %91 = tpu.matmul %88, %90, %cst_38 {dimension_numbers = #tpu.dot_dimension_numbers<[1], [0], [0], [1], [0, 0, 1, 1], [], []>} : vector<8x16xbf16>, vector<16x128xbf16>, vector<8x128xf32> -> vector<8x128xf32>
    %92 = arith.addf %65, %91 : vector<8x128xf32>
    %c24 = arith.constant 24 : index
    %c0_39 = arith.constant 0 : index
    %93 = vector.load %arg10[%c24, %c0_39] : memref<128x64xf32, #tpu.memory_space<vmem>>, vector<8x64xf32>
    %94 = arith.truncf %87 : vector<8x16xf32> to vector<8x16xbf16>
    %cst_40 = arith.constant dense<0.000000e+00> : vector<8x64xf32>
    %95 = tpu.matmul %94, %8, %cst_40 {dimension_numbers = #tpu.dot_dimension_numbers<[1], [0], [0], [1], [0, 0, 1, 1], [], []>} : vector<8x16xbf16>, vector<16x64xbf16>, vector<8x64xf32> -> vector<8x64xf32>
    %96 = arith.addf %93, %95 : vector<8x64xf32>
    %97 = arith.negf %96 : vector<8x64xf32>
    %98 = math.exp %97 : vector<8x64xf32>
    %cst_41 = arith.constant 1.000000e+00 : f32
    %99 = vector.broadcast %cst_41 : f32 to vector<8x64xf32>
    %100 = arith.addf %99, %98 : vector<8x64xf32>
    %101 = arith.divf %99, %100 : vector<8x64xf32>
    %102 = vector.extract_strided_slice %101 {offsets = [0, 0], sizes = [8, 16], strides = [1, 1]} : vector<8x64xf32> to vector<8x16xf32>
    %103 = vector.extract_strided_slice %101 {offsets = [0, 16], sizes = [8, 16], strides = [1, 1]} : vector<8x64xf32> to vector<8x16xf32>
    %104 = vector.extract_strided_slice %101 {offsets = [0, 32], sizes = [8, 16], strides = [1, 1]} : vector<8x64xf32> to vector<8x16xf32>
    %cst_42 = arith.constant 2.000000e+00 : f32
    %105 = vector.broadcast %cst_42 : f32 to vector<8x16xf32>
    %106 = arith.mulf %105, %104 : vector<8x16xf32>
    %cst_43 = arith.constant 1.000000e+00 : f32
    %107 = vector.broadcast %cst_43 : f32 to vector<8x16xf32>
    %108 = arith.subf %106, %107 : vector<8x16xf32>
    %109 = vector.extract_strided_slice %101 {offsets = [0, 48], sizes = [8, 16], strides = [1, 1]} : vector<8x64xf32> to vector<8x16xf32>
    %110 = arith.mulf %103, %85 : vector<8x16xf32>
    %111 = arith.mulf %102, %108 : vector<8x16xf32>
    %112 = arith.addf %110, %111 : vector<8x16xf32>
    %113 = math.tanh %112 : vector<8x16xf32>
    %114 = arith.mulf %109, %113 : vector<8x16xf32>
    %115 = arith.truncf %114 : vector<8x16xf32> to vector<8x16xbf16>
    %c3 = arith.constant 3 : index
    %c0_44 = arith.constant 0 : index
    %c0_45 = arith.constant 0 : index
    %116 = vector.load %arg5[%c3, %c0_44, %c0_45] : memref<16x16x128xbf16, #tpu.memory_space<vmem>>, vector<1x16x128xbf16>
    %117 = vector.shape_cast %116 : vector<1x16x128xbf16> to vector<16x128xbf16>
    %cst_46 = arith.constant dense<0.000000e+00> : vector<8x128xf32>
    %118 = tpu.matmul %115, %117, %cst_46 {dimension_numbers = #tpu.dot_dimension_numbers<[1], [0], [0], [1], [0, 0, 1, 1], [], []>} : vector<8x16xbf16>, vector<16x128xbf16>, vector<8x128xf32> -> vector<8x128xf32>
    %119 = arith.addf %92, %118 : vector<8x128xf32>
    %c32 = arith.constant 32 : index
    %c0_47 = arith.constant 0 : index
    %120 = vector.load %arg10[%c32, %c0_47] : memref<128x64xf32, #tpu.memory_space<vmem>>, vector<8x64xf32>
    %121 = arith.truncf %114 : vector<8x16xf32> to vector<8x16xbf16>
    %cst_48 = arith.constant dense<0.000000e+00> : vector<8x64xf32>
    %122 = tpu.matmul %121, %8, %cst_48 {dimension_numbers = #tpu.dot_dimension_numbers<[1], [0], [0], [1], [0, 0, 1, 1], [], []>} : vector<8x16xbf16>, vector<16x64xbf16>, vector<8x64xf32> -> vector<8x64xf32>
    %123 = arith.addf %120, %122 : vector<8x64xf32>
    %124 = arith.negf %123 : vector<8x64xf32>
    %125 = math.exp %124 : vector<8x64xf32>
    %cst_49 = arith.constant 1.000000e+00 : f32
    %126 = vector.broadcast %cst_49 : f32 to vector<8x64xf32>
    %127 = arith.addf %126, %125 : vector<8x64xf32>
    %128 = arith.divf %126, %127 : vector<8x64xf32>
    %129 = vector.extract_strided_slice %128 {offsets = [0, 0], sizes = [8, 16], strides = [1, 1]} : vector<8x64xf32> to vector<8x16xf32>
    %130 = vector.extract_strided_slice %128 {offsets = [0, 16], sizes = [8, 16], strides = [1, 1]} : vector<8x64xf32> to vector<8x16xf32>
    %131 = vector.extract_strided_slice %128 {offsets = [0, 32], sizes = [8, 16], strides = [1, 1]} : vector<8x64xf32> to vector<8x16xf32>
    %cst_50 = arith.constant 2.000000e+00 : f32
    %132 = vector.broadcast %cst_50 : f32 to vector<8x16xf32>
    %133 = arith.mulf %132, %131 : vector<8x16xf32>
    %cst_51 = arith.constant 1.000000e+00 : f32
    %134 = vector.broadcast %cst_51 : f32 to vector<8x16xf32>
    %135 = arith.subf %133, %134 : vector<8x16xf32>
    %136 = vector.extract_strided_slice %128 {offsets = [0, 48], sizes = [8, 16], strides = [1, 1]} : vector<8x64xf32> to vector<8x16xf32>
    %137 = arith.mulf %130, %112 : vector<8x16xf32>
    %138 = arith.mulf %129, %135 : vector<8x16xf32>
    %139 = arith.addf %137, %138 : vector<8x16xf32>
    %140 = math.tanh %139 : vector<8x16xf32>
    %141 = arith.mulf %136, %140 : vector<8x16xf32>
    %142 = arith.truncf %141 : vector<8x16xf32> to vector<8x16xbf16>
    %c4 = arith.constant 4 : index
    %c0_52 = arith.constant 0 : index
    %c0_53 = arith.constant 0 : index
    %143 = vector.load %arg5[%c4, %c0_52, %c0_53] : memref<16x16x128xbf16, #tpu.memory_space<vmem>>, vector<1x16x128xbf16>
    %144 = vector.shape_cast %143 : vector<1x16x128xbf16> to vector<16x128xbf16>
    %cst_54 = arith.constant dense<0.000000e+00> : vector<8x128xf32>
    %145 = tpu.matmul %142, %144, %cst_54 {dimension_numbers = #tpu.dot_dimension_numbers<[1], [0], [0], [1], [0, 0, 1, 1], [], []>} : vector<8x16xbf16>, vector<16x128xbf16>, vector<8x128xf32> -> vector<8x128xf32>
    %146 = arith.addf %119, %145 : vector<8x128xf32>
    %c40 = arith.constant 40 : index
    %c0_55 = arith.constant 0 : index
    %147 = vector.load %arg10[%c40, %c0_55] : memref<128x64xf32, #tpu.memory_space<vmem>>, vector<8x64xf32>
    %148 = arith.truncf %141 : vector<8x16xf32> to vector<8x16xbf16>
    %cst_56 = arith.constant dense<0.000000e+00> : vector<8x64xf32>
    %149 = tpu.matmul %148, %8, %cst_56 {dimension_numbers = #tpu.dot_dimension_numbers<[1], [0], [0], [1], [0, 0, 1, 1], [], []>} : vector<8x16xbf16>, vector<16x64xbf16>, vector<8x64xf32> -> vector<8x64xf32>
    %150 = arith.addf %147, %149 : vector<8x64xf32>
    %151 = arith.negf %150 : vector<8x64xf32>
    %152 = math.exp %151 : vector<8x64xf32>
    %cst_57 = arith.constant 1.000000e+00 : f32
    %153 = vector.broadcast %cst_57 : f32 to vector<8x64xf32>
    %154 = arith.addf %153, %152 : vector<8x64xf32>
    %155 = arith.divf %153, %154 : vector<8x64xf32>
    %156 = vector.extract_strided_slice %155 {offsets = [0, 0], sizes = [8, 16], strides = [1, 1]} : vector<8x64xf32> to vector<8x16xf32>
    %157 = vector.extract_strided_slice %155 {offsets = [0, 16], sizes = [8, 16], strides = [1, 1]} : vector<8x64xf32> to vector<8x16xf32>
    %158 = vector.extract_strided_slice %155 {offsets = [0, 32], sizes = [8, 16], strides = [1, 1]} : vector<8x64xf32> to vector<8x16xf32>
    %cst_58 = arith.constant 2.000000e+00 : f32
    %159 = vector.broadcast %cst_58 : f32 to vector<8x16xf32>
    %160 = arith.mulf %159, %158 : vector<8x16xf32>
    %cst_59 = arith.constant 1.000000e+00 : f32
    %161 = vector.broadcast %cst_59 : f32 to vector<8x16xf32>
    %162 = arith.subf %160, %161 : vector<8x16xf32>
    %163 = vector.extract_strided_slice %155 {offsets = [0, 48], sizes = [8, 16], strides = [1, 1]} : vector<8x64xf32> to vector<8x16xf32>
    %164 = arith.mulf %157, %139 : vector<8x16xf32>
    %165 = arith.mulf %156, %162 : vector<8x16xf32>
    %166 = arith.addf %164, %165 : vector<8x16xf32>
    %167 = math.tanh %166 : vector<8x16xf32>
    %168 = arith.mulf %163, %167 : vector<8x16xf32>
    %169 = arith.truncf %168 : vector<8x16xf32> to vector<8x16xbf16>
    %c5 = arith.constant 5 : index
    %c0_60 = arith.constant 0 : index
    %c0_61 = arith.constant 0 : index
    %170 = vector.load %arg5[%c5, %c0_60, %c0_61] : memref<16x16x128xbf16, #tpu.memory_space<vmem>>, vector<1x16x128xbf16>
    %171 = vector.shape_cast %170 : vector<1x16x128xbf16> to vector<16x128xbf16>
    %cst_62 = arith.constant dense<0.000000e+00> : vector<8x128xf32>
    %172 = tpu.matmul %169, %171, %cst_62 {dimension_numbers = #tpu.dot_dimension_numbers<[1], [0], [0], [1], [0, 0, 1, 1], [], []>} : vector<8x16xbf16>, vector<16x128xbf16>, vector<8x128xf32> -> vector<8x128xf32>
    %173 = arith.addf %146, %172 : vector<8x128xf32>
    %c48 = arith.constant 48 : index
    %c0_63 = arith.constant 0 : index
    %174 = vector.load %arg10[%c48, %c0_63] : memref<128x64xf32, #tpu.memory_space<vmem>>, vector<8x64xf32>
    %175 = arith.truncf %168 : vector<8x16xf32> to vector<8x16xbf16>
    %cst_64 = arith.constant dense<0.000000e+00> : vector<8x64xf32>
    %176 = tpu.matmul %175, %8, %cst_64 {dimension_numbers = #tpu.dot_dimension_numbers<[1], [0], [0], [1], [0, 0, 1, 1], [], []>} : vector<8x16xbf16>, vector<16x64xbf16>, vector<8x64xf32> -> vector<8x64xf32>
    %177 = arith.addf %174, %176 : vector<8x64xf32>
    %178 = arith.negf %177 : vector<8x64xf32>
    %179 = math.exp %178 : vector<8x64xf32>
    %cst_65 = arith.constant 1.000000e+00 : f32
    %180 = vector.broadcast %cst_65 : f32 to vector<8x64xf32>
    %181 = arith.addf %180, %179 : vector<8x64xf32>
    %182 = arith.divf %180, %181 : vector<8x64xf32>
    %183 = vector.extract_strided_slice %182 {offsets = [0, 0], sizes = [8, 16], strides = [1, 1]} : vector<8x64xf32> to vector<8x16xf32>
    %184 = vector.extract_strided_slice %182 {offsets = [0, 16], sizes = [8, 16], strides = [1, 1]} : vector<8x64xf32> to vector<8x16xf32>
    %185 = vector.extract_strided_slice %182 {offsets = [0, 32], sizes = [8, 16], strides = [1, 1]} : vector<8x64xf32> to vector<8x16xf32>
    %cst_66 = arith.constant 2.000000e+00 : f32
    %186 = vector.broadcast %cst_66 : f32 to vector<8x16xf32>
    %187 = arith.mulf %186, %185 : vector<8x16xf32>
    %cst_67 = arith.constant 1.000000e+00 : f32
    %188 = vector.broadcast %cst_67 : f32 to vector<8x16xf32>
    %189 = arith.subf %187, %188 : vector<8x16xf32>
    %190 = vector.extract_strided_slice %182 {offsets = [0, 48], sizes = [8, 16], strides = [1, 1]} : vector<8x64xf32> to vector<8x16xf32>
    %191 = arith.mulf %184, %166 : vector<8x16xf32>
    %192 = arith.mulf %183, %189 : vector<8x16xf32>
    %193 = arith.addf %191, %192 : vector<8x16xf32>
    %194 = math.tanh %193 : vector<8x16xf32>
    %195 = arith.mulf %190, %194 : vector<8x16xf32>
    %196 = arith.truncf %195 : vector<8x16xf32> to vector<8x16xbf16>
    %c6 = arith.constant 6 : index
    %c0_68 = arith.constant 0 : index
    %c0_69 = arith.constant 0 : index
    %197 = vector.load %arg5[%c6, %c0_68, %c0_69] : memref<16x16x128xbf16, #tpu.memory_space<vmem>>, vector<1x16x128xbf16>
    %198 = vector.shape_cast %197 : vector<1x16x128xbf16> to vector<16x128xbf16>
    %cst_70 = arith.constant dense<0.000000e+00> : vector<8x128xf32>
    %199 = tpu.matmul %196, %198, %cst_70 {dimension_numbers = #tpu.dot_dimension_numbers<[1], [0], [0], [1], [0, 0, 1, 1], [], []>} : vector<8x16xbf16>, vector<16x128xbf16>, vector<8x128xf32> -> vector<8x128xf32>
    %200 = arith.addf %173, %199 : vector<8x128xf32>
    %c56 = arith.constant 56 : index
    %c0_71 = arith.constant 0 : index
    %201 = vector.load %arg10[%c56, %c0_71] : memref<128x64xf32, #tpu.memory_space<vmem>>, vector<8x64xf32>
    %202 = arith.truncf %195 : vector<8x16xf32> to vector<8x16xbf16>
    %cst_72 = arith.constant dense<0.000000e+00> : vector<8x64xf32>
    %203 = tpu.matmul %202, %8, %cst_72 {dimension_numbers = #tpu.dot_dimension_numbers<[1], [0], [0], [1], [0, 0, 1, 1], [], []>} : vector<8x16xbf16>, vector<16x64xbf16>, vector<8x64xf32> -> vector<8x64xf32>
    %204 = arith.addf %201, %203 : vector<8x64xf32>
    %205 = arith.negf %204 : vector<8x64xf32>
    %206 = math.exp %205 : vector<8x64xf32>
    %cst_73 = arith.constant 1.000000e+00 : f32
    %207 = vector.broadcast %cst_73 : f32 to vector<8x64xf32>
    %208 = arith.addf %207, %206 : vector<8x64xf32>
    %209 = arith.divf %207, %208 : vector<8x64xf32>
    %210 = vector.extract_strided_slice %209 {offsets = [0, 0], sizes = [8, 16], strides = [1, 1]} : vector<8x64xf32> to vector<8x16xf32>
    %211 = vector.extract_strided_slice %209 {offsets = [0, 16], sizes = [8, 16], strides = [1, 1]} : vector<8x64xf32> to vector<8x16xf32>
    %212 = vector.extract_strided_slice %209 {offsets = [0, 32], sizes = [8, 16], strides = [1, 1]} : vector<8x64xf32> to vector<8x16xf32>
    %cst_74 = arith.constant 2.000000e+00 : f32
    %213 = vector.broadcast %cst_74 : f32 to vector<8x16xf32>
    %214 = arith.mulf %213, %212 : vector<8x16xf32>
    %cst_75 = arith.constant 1.000000e+00 : f32
    %215 = vector.broadcast %cst_75 : f32 to vector<8x16xf32>
    %216 = arith.subf %214, %215 : vector<8x16xf32>
    %217 = vector.extract_strided_slice %209 {offsets = [0, 48], sizes = [8, 16], strides = [1, 1]} : vector<8x64xf32> to vector<8x16xf32>
    %218 = arith.mulf %211, %193 : vector<8x16xf32>
    %219 = arith.mulf %210, %216 : vector<8x16xf32>
    %220 = arith.addf %218, %219 : vector<8x16xf32>
    %221 = math.tanh %220 : vector<8x16xf32>
    %222 = arith.mulf %217, %221 : vector<8x16xf32>
    %223 = arith.truncf %222 : vector<8x16xf32> to vector<8x16xbf16>
    %c7 = arith.constant 7 : index
    %c0_76 = arith.constant 0 : index
    %c0_77 = arith.constant 0 : index
    %224 = vector.load %arg5[%c7, %c0_76, %c0_77] : memref<16x16x128xbf16, #tpu.memory_space<vmem>>, vector<1x16x128xbf16>
    %225 = vector.shape_cast %224 : vector<1x16x128xbf16> to vector<16x128xbf16>
    %cst_78 = arith.constant dense<0.000000e+00> : vector<8x128xf32>
    %226 = tpu.matmul %223, %225, %cst_78 {dimension_numbers = #tpu.dot_dimension_numbers<[1], [0], [0], [1], [0, 0, 1, 1], [], []>} : vector<8x16xbf16>, vector<16x128xbf16>, vector<8x128xf32> -> vector<8x128xf32>
    %227 = arith.addf %200, %226 : vector<8x128xf32>
    %c64 = arith.constant 64 : index
    %c0_79 = arith.constant 0 : index
    %228 = vector.load %arg10[%c64, %c0_79] : memref<128x64xf32, #tpu.memory_space<vmem>>, vector<8x64xf32>
    %229 = arith.truncf %222 : vector<8x16xf32> to vector<8x16xbf16>
    %cst_80 = arith.constant dense<0.000000e+00> : vector<8x64xf32>
    %230 = tpu.matmul %229, %8, %cst_80 {dimension_numbers = #tpu.dot_dimension_numbers<[1], [0], [0], [1], [0, 0, 1, 1], [], []>} : vector<8x16xbf16>, vector<16x64xbf16>, vector<8x64xf32> -> vector<8x64xf32>
    %231 = arith.addf %228, %230 : vector<8x64xf32>
    %232 = arith.negf %231 : vector<8x64xf32>
    %233 = math.exp %232 : vector<8x64xf32>
    %cst_81 = arith.constant 1.000000e+00 : f32
    %234 = vector.broadcast %cst_81 : f32 to vector<8x64xf32>
    %235 = arith.addf %234, %233 : vector<8x64xf32>
    %236 = arith.divf %234, %235 : vector<8x64xf32>
    %237 = vector.extract_strided_slice %236 {offsets = [0, 0], sizes = [8, 16], strides = [1, 1]} : vector<8x64xf32> to vector<8x16xf32>
    %238 = vector.extract_strided_slice %236 {offsets = [0, 16], sizes = [8, 16], strides = [1, 1]} : vector<8x64xf32> to vector<8x16xf32>
    %239 = vector.extract_strided_slice %236 {offsets = [0, 32], sizes = [8, 16], strides = [1, 1]} : vector<8x64xf32> to vector<8x16xf32>
    %cst_82 = arith.constant 2.000000e+00 : f32
    %240 = vector.broadcast %cst_82 : f32 to vector<8x16xf32>
    %241 = arith.mulf %240, %239 : vector<8x16xf32>
    %cst_83 = arith.constant 1.000000e+00 : f32
    %242 = vector.broadcast %cst_83 : f32 to vector<8x16xf32>
    %243 = arith.subf %241, %242 : vector<8x16xf32>
    %244 = vector.extract_strided_slice %236 {offsets = [0, 48], sizes = [8, 16], strides = [1, 1]} : vector<8x64xf32> to vector<8x16xf32>
    %245 = arith.mulf %238, %220 : vector<8x16xf32>
    %246 = arith.mulf %237, %243 : vector<8x16xf32>
    %247 = arith.addf %245, %246 : vector<8x16xf32>
    %248 = math.tanh %247 : vector<8x16xf32>
    %249 = arith.mulf %244, %248 : vector<8x16xf32>
    %250 = arith.truncf %249 : vector<8x16xf32> to vector<8x16xbf16>
    %c8_84 = arith.constant 8 : index
    %c0_85 = arith.constant 0 : index
    %c0_86 = arith.constant 0 : index
    %251 = vector.load %arg5[%c8_84, %c0_85, %c0_86] : memref<16x16x128xbf16, #tpu.memory_space<vmem>>, vector<1x16x128xbf16>
    %252 = vector.shape_cast %251 : vector<1x16x128xbf16> to vector<16x128xbf16>
    %cst_87 = arith.constant dense<0.000000e+00> : vector<8x128xf32>
    %253 = tpu.matmul %250, %252, %cst_87 {dimension_numbers = #tpu.dot_dimension_numbers<[1], [0], [0], [1], [0, 0, 1, 1], [], []>} : vector<8x16xbf16>, vector<16x128xbf16>, vector<8x128xf32> -> vector<8x128xf32>
    %254 = arith.addf %227, %253 : vector<8x128xf32>
    %c72 = arith.constant 72 : index
    %c0_88 = arith.constant 0 : index
    %255 = vector.load %arg10[%c72, %c0_88] : memref<128x64xf32, #tpu.memory_space<vmem>>, vector<8x64xf32>
    %256 = arith.truncf %249 : vector<8x16xf32> to vector<8x16xbf16>
    %cst_89 = arith.constant dense<0.000000e+00> : vector<8x64xf32>
    %257 = tpu.matmul %256, %8, %cst_89 {dimension_numbers = #tpu.dot_dimension_numbers<[1], [0], [0], [1], [0, 0, 1, 1], [], []>} : vector<8x16xbf16>, vector<16x64xbf16>, vector<8x64xf32> -> vector<8x64xf32>
    %258 = arith.addf %255, %257 : vector<8x64xf32>
    %259 = arith.negf %258 : vector<8x64xf32>
    %260 = math.exp %259 : vector<8x64xf32>
    %cst_90 = arith.constant 1.000000e+00 : f32
    %261 = vector.broadcast %cst_90 : f32 to vector<8x64xf32>
    %262 = arith.addf %261, %260 : vector<8x64xf32>
    %263 = arith.divf %261, %262 : vector<8x64xf32>
    %264 = vector.extract_strided_slice %263 {offsets = [0, 0], sizes = [8, 16], strides = [1, 1]} : vector<8x64xf32> to vector<8x16xf32>
    %265 = vector.extract_strided_slice %263 {offsets = [0, 16], sizes = [8, 16], strides = [1, 1]} : vector<8x64xf32> to vector<8x16xf32>
    %266 = vector.extract_strided_slice %263 {offsets = [0, 32], sizes = [8, 16], strides = [1, 1]} : vector<8x64xf32> to vector<8x16xf32>
    %cst_91 = arith.constant 2.000000e+00 : f32
    %267 = vector.broadcast %cst_91 : f32 to vector<8x16xf32>
    %268 = arith.mulf %267, %266 : vector<8x16xf32>
    %cst_92 = arith.constant 1.000000e+00 : f32
    %269 = vector.broadcast %cst_92 : f32 to vector<8x16xf32>
    %270 = arith.subf %268, %269 : vector<8x16xf32>
    %271 = vector.extract_strided_slice %263 {offsets = [0, 48], sizes = [8, 16], strides = [1, 1]} : vector<8x64xf32> to vector<8x16xf32>
    %272 = arith.mulf %265, %247 : vector<8x16xf32>
    %273 = arith.mulf %264, %270 : vector<8x16xf32>
    %274 = arith.addf %272, %273 : vector<8x16xf32>
    %275 = math.tanh %274 : vector<8x16xf32>
    %276 = arith.mulf %271, %275 : vector<8x16xf32>
    %277 = arith.truncf %276 : vector<8x16xf32> to vector<8x16xbf16>
    %c9 = arith.constant 9 : index
    %c0_93 = arith.constant 0 : index
    %c0_94 = arith.constant 0 : index
    %278 = vector.load %arg5[%c9, %c0_93, %c0_94] : memref<16x16x128xbf16, #tpu.memory_space<vmem>>, vector<1x16x128xbf16>
    %279 = vector.shape_cast %278 : vector<1x16x128xbf16> to vector<16x128xbf16>
    %cst_95 = arith.constant dense<0.000000e+00> : vector<8x128xf32>
    %280 = tpu.matmul %277, %279, %cst_95 {dimension_numbers = #tpu.dot_dimension_numbers<[1], [0], [0], [1], [0, 0, 1, 1], [], []>} : vector<8x16xbf16>, vector<16x128xbf16>, vector<8x128xf32> -> vector<8x128xf32>
    %281 = arith.addf %254, %280 : vector<8x128xf32>
    %c80 = arith.constant 80 : index
    %c0_96 = arith.constant 0 : index
    %282 = vector.load %arg10[%c80, %c0_96] : memref<128x64xf32, #tpu.memory_space<vmem>>, vector<8x64xf32>
    %283 = arith.truncf %276 : vector<8x16xf32> to vector<8x16xbf16>
    %cst_97 = arith.constant dense<0.000000e+00> : vector<8x64xf32>
    %284 = tpu.matmul %283, %8, %cst_97 {dimension_numbers = #tpu.dot_dimension_numbers<[1], [0], [0], [1], [0, 0, 1, 1], [], []>} : vector<8x16xbf16>, vector<16x64xbf16>, vector<8x64xf32> -> vector<8x64xf32>
    %285 = arith.addf %282, %284 : vector<8x64xf32>
    %286 = arith.negf %285 : vector<8x64xf32>
    %287 = math.exp %286 : vector<8x64xf32>
    %cst_98 = arith.constant 1.000000e+00 : f32
    %288 = vector.broadcast %cst_98 : f32 to vector<8x64xf32>
    %289 = arith.addf %288, %287 : vector<8x64xf32>
    %290 = arith.divf %288, %289 : vector<8x64xf32>
    %291 = vector.extract_strided_slice %290 {offsets = [0, 0], sizes = [8, 16], strides = [1, 1]} : vector<8x64xf32> to vector<8x16xf32>
    %292 = vector.extract_strided_slice %290 {offsets = [0, 16], sizes = [8, 16], strides = [1, 1]} : vector<8x64xf32> to vector<8x16xf32>
    %293 = vector.extract_strided_slice %290 {offsets = [0, 32], sizes = [8, 16], strides = [1, 1]} : vector<8x64xf32> to vector<8x16xf32>
    %cst_99 = arith.constant 2.000000e+00 : f32
    %294 = vector.broadcast %cst_99 : f32 to vector<8x16xf32>
    %295 = arith.mulf %294, %293 : vector<8x16xf32>
    %cst_100 = arith.constant 1.000000e+00 : f32
    %296 = vector.broadcast %cst_100 : f32 to vector<8x16xf32>
    %297 = arith.subf %295, %296 : vector<8x16xf32>
    %298 = vector.extract_strided_slice %290 {offsets = [0, 48], sizes = [8, 16], strides = [1, 1]} : vector<8x64xf32> to vector<8x16xf32>
    %299 = arith.mulf %292, %274 : vector<8x16xf32>
    %300 = arith.mulf %291, %297 : vector<8x16xf32>
    %301 = arith.addf %299, %300 : vector<8x16xf32>
    %302 = math.tanh %301 : vector<8x16xf32>
    %303 = arith.mulf %298, %302 : vector<8x16xf32>
    %304 = arith.truncf %303 : vector<8x16xf32> to vector<8x16xbf16>
    %c10 = arith.constant 10 : index
    %c0_101 = arith.constant 0 : index
    %c0_102 = arith.constant 0 : index
    %305 = vector.load %arg5[%c10, %c0_101, %c0_102] : memref<16x16x128xbf16, #tpu.memory_space<vmem>>, vector<1x16x128xbf16>
    %306 = vector.shape_cast %305 : vector<1x16x128xbf16> to vector<16x128xbf16>
    %cst_103 = arith.constant dense<0.000000e+00> : vector<8x128xf32>
    %307 = tpu.matmul %304, %306, %cst_103 {dimension_numbers = #tpu.dot_dimension_numbers<[1], [0], [0], [1], [0, 0, 1, 1], [], []>} : vector<8x16xbf16>, vector<16x128xbf16>, vector<8x128xf32> -> vector<8x128xf32>
    %308 = arith.addf %281, %307 : vector<8x128xf32>
    %c88 = arith.constant 88 : index
    %c0_104 = arith.constant 0 : index
    %309 = vector.load %arg10[%c88, %c0_104] : memref<128x64xf32, #tpu.memory_space<vmem>>, vector<8x64xf32>
    %310 = arith.truncf %303 : vector<8x16xf32> to vector<8x16xbf16>
    %cst_105 = arith.constant dense<0.000000e+00> : vector<8x64xf32>
    %311 = tpu.matmul %310, %8, %cst_105 {dimension_numbers = #tpu.dot_dimension_numbers<[1], [0], [0], [1], [0, 0, 1, 1], [], []>} : vector<8x16xbf16>, vector<16x64xbf16>, vector<8x64xf32> -> vector<8x64xf32>
    %312 = arith.addf %309, %311 : vector<8x64xf32>
    %313 = arith.negf %312 : vector<8x64xf32>
    %314 = math.exp %313 : vector<8x64xf32>
    %cst_106 = arith.constant 1.000000e+00 : f32
    %315 = vector.broadcast %cst_106 : f32 to vector<8x64xf32>
    %316 = arith.addf %315, %314 : vector<8x64xf32>
    %317 = arith.divf %315, %316 : vector<8x64xf32>
    %318 = vector.extract_strided_slice %317 {offsets = [0, 0], sizes = [8, 16], strides = [1, 1]} : vector<8x64xf32> to vector<8x16xf32>
    %319 = vector.extract_strided_slice %317 {offsets = [0, 16], sizes = [8, 16], strides = [1, 1]} : vector<8x64xf32> to vector<8x16xf32>
    %320 = vector.extract_strided_slice %317 {offsets = [0, 32], sizes = [8, 16], strides = [1, 1]} : vector<8x64xf32> to vector<8x16xf32>
    %cst_107 = arith.constant 2.000000e+00 : f32
    %321 = vector.broadcast %cst_107 : f32 to vector<8x16xf32>
    %322 = arith.mulf %321, %320 : vector<8x16xf32>
    %cst_108 = arith.constant 1.000000e+00 : f32
    %323 = vector.broadcast %cst_108 : f32 to vector<8x16xf32>
    %324 = arith.subf %322, %323 : vector<8x16xf32>
    %325 = vector.extract_strided_slice %317 {offsets = [0, 48], sizes = [8, 16], strides = [1, 1]} : vector<8x64xf32> to vector<8x16xf32>
    %326 = arith.mulf %319, %301 : vector<8x16xf32>
    %327 = arith.mulf %318, %324 : vector<8x16xf32>
    %328 = arith.addf %326, %327 : vector<8x16xf32>
    %329 = math.tanh %328 : vector<8x16xf32>
    %330 = arith.mulf %325, %329 : vector<8x16xf32>
    %331 = arith.truncf %330 : vector<8x16xf32> to vector<8x16xbf16>
    %c11 = arith.constant 11 : index
    %c0_109 = arith.constant 0 : index
    %c0_110 = arith.constant 0 : index
    %332 = vector.load %arg5[%c11, %c0_109, %c0_110] : memref<16x16x128xbf16, #tpu.memory_space<vmem>>, vector<1x16x128xbf16>
    %333 = vector.shape_cast %332 : vector<1x16x128xbf16> to vector<16x128xbf16>
    %cst_111 = arith.constant dense<0.000000e+00> : vector<8x128xf32>
    %334 = tpu.matmul %331, %333, %cst_111 {dimension_numbers = #tpu.dot_dimension_numbers<[1], [0], [0], [1], [0, 0, 1, 1], [], []>} : vector<8x16xbf16>, vector<16x128xbf16>, vector<8x128xf32> -> vector<8x128xf32>
    %335 = arith.addf %308, %334 : vector<8x128xf32>
    %c96 = arith.constant 96 : index
    %c0_112 = arith.constant 0 : index
    %336 = vector.load %arg10[%c96, %c0_112] : memref<128x64xf32, #tpu.memory_space<vmem>>, vector<8x64xf32>
    %337 = arith.truncf %330 : vector<8x16xf32> to vector<8x16xbf16>
    %cst_113 = arith.constant dense<0.000000e+00> : vector<8x64xf32>
    %338 = tpu.matmul %337, %8, %cst_113 {dimension_numbers = #tpu.dot_dimension_numbers<[1], [0], [0], [1], [0, 0, 1, 1], [], []>} : vector<8x16xbf16>, vector<16x64xbf16>, vector<8x64xf32> -> vector<8x64xf32>
    %339 = arith.addf %336, %338 : vector<8x64xf32>
    %340 = arith.negf %339 : vector<8x64xf32>
    %341 = math.exp %340 : vector<8x64xf32>
    %cst_114 = arith.constant 1.000000e+00 : f32
    %342 = vector.broadcast %cst_114 : f32 to vector<8x64xf32>
    %343 = arith.addf %342, %341 : vector<8x64xf32>
    %344 = arith.divf %342, %343 : vector<8x64xf32>
    %345 = vector.extract_strided_slice %344 {offsets = [0, 0], sizes = [8, 16], strides = [1, 1]} : vector<8x64xf32> to vector<8x16xf32>
    %346 = vector.extract_strided_slice %344 {offsets = [0, 16], sizes = [8, 16], strides = [1, 1]} : vector<8x64xf32> to vector<8x16xf32>
    %347 = vector.extract_strided_slice %344 {offsets = [0, 32], sizes = [8, 16], strides = [1, 1]} : vector<8x64xf32> to vector<8x16xf32>
    %cst_115 = arith.constant 2.000000e+00 : f32
    %348 = vector.broadcast %cst_115 : f32 to vector<8x16xf32>
    %349 = arith.mulf %348, %347 : vector<8x16xf32>
    %cst_116 = arith.constant 1.000000e+00 : f32
    %350 = vector.broadcast %cst_116 : f32 to vector<8x16xf32>
    %351 = arith.subf %349, %350 : vector<8x16xf32>
    %352 = vector.extract_strided_slice %344 {offsets = [0, 48], sizes = [8, 16], strides = [1, 1]} : vector<8x64xf32> to vector<8x16xf32>
    %353 = arith.mulf %346, %328 : vector<8x16xf32>
    %354 = arith.mulf %345, %351 : vector<8x16xf32>
    %355 = arith.addf %353, %354 : vector<8x16xf32>
    %356 = math.tanh %355 : vector<8x16xf32>
    %357 = arith.mulf %352, %356 : vector<8x16xf32>
    %358 = arith.truncf %357 : vector<8x16xf32> to vector<8x16xbf16>
    %c12 = arith.constant 12 : index
    %c0_117 = arith.constant 0 : index
    %c0_118 = arith.constant 0 : index
    %359 = vector.load %arg5[%c12, %c0_117, %c0_118] : memref<16x16x128xbf16, #tpu.memory_space<vmem>>, vector<1x16x128xbf16>
    %360 = vector.shape_cast %359 : vector<1x16x128xbf16> to vector<16x128xbf16>
    %cst_119 = arith.constant dense<0.000000e+00> : vector<8x128xf32>
    %361 = tpu.matmul %358, %360, %cst_119 {dimension_numbers = #tpu.dot_dimension_numbers<[1], [0], [0], [1], [0, 0, 1, 1], [], []>} : vector<8x16xbf16>, vector<16x128xbf16>, vector<8x128xf32> -> vector<8x128xf32>
    %362 = arith.addf %335, %361 : vector<8x128xf32>
    %c104 = arith.constant 104 : index
    %c0_120 = arith.constant 0 : index
    %363 = vector.load %arg10[%c104, %c0_120] : memref<128x64xf32, #tpu.memory_space<vmem>>, vector<8x64xf32>
    %364 = arith.truncf %357 : vector<8x16xf32> to vector<8x16xbf16>
    %cst_121 = arith.constant dense<0.000000e+00> : vector<8x64xf32>
    %365 = tpu.matmul %364, %8, %cst_121 {dimension_numbers = #tpu.dot_dimension_numbers<[1], [0], [0], [1], [0, 0, 1, 1], [], []>} : vector<8x16xbf16>, vector<16x64xbf16>, vector<8x64xf32> -> vector<8x64xf32>
    %366 = arith.addf %363, %365 : vector<8x64xf32>
    %367 = arith.negf %366 : vector<8x64xf32>
    %368 = math.exp %367 : vector<8x64xf32>
    %cst_122 = arith.constant 1.000000e+00 : f32
    %369 = vector.broadcast %cst_122 : f32 to vector<8x64xf32>
    %370 = arith.addf %369, %368 : vector<8x64xf32>
    %371 = arith.divf %369, %370 : vector<8x64xf32>
    %372 = vector.extract_strided_slice %371 {offsets = [0, 0], sizes = [8, 16], strides = [1, 1]} : vector<8x64xf32> to vector<8x16xf32>
    %373 = vector.extract_strided_slice %371 {offsets = [0, 16], sizes = [8, 16], strides = [1, 1]} : vector<8x64xf32> to vector<8x16xf32>
    %374 = vector.extract_strided_slice %371 {offsets = [0, 32], sizes = [8, 16], strides = [1, 1]} : vector<8x64xf32> to vector<8x16xf32>
    %cst_123 = arith.constant 2.000000e+00 : f32
    %375 = vector.broadcast %cst_123 : f32 to vector<8x16xf32>
    %376 = arith.mulf %375, %374 : vector<8x16xf32>
    %cst_124 = arith.constant 1.000000e+00 : f32
    %377 = vector.broadcast %cst_124 : f32 to vector<8x16xf32>
    %378 = arith.subf %376, %377 : vector<8x16xf32>
    %379 = vector.extract_strided_slice %371 {offsets = [0, 48], sizes = [8, 16], strides = [1, 1]} : vector<8x64xf32> to vector<8x16xf32>
    %380 = arith.mulf %373, %355 : vector<8x16xf32>
    %381 = arith.mulf %372, %378 : vector<8x16xf32>
    %382 = arith.addf %380, %381 : vector<8x16xf32>
    %383 = math.tanh %382 : vector<8x16xf32>
    %384 = arith.mulf %379, %383 : vector<8x16xf32>
    %385 = arith.truncf %384 : vector<8x16xf32> to vector<8x16xbf16>
    %c13 = arith.constant 13 : index
    %c0_125 = arith.constant 0 : index
    %c0_126 = arith.constant 0 : index
    %386 = vector.load %arg5[%c13, %c0_125, %c0_126] : memref<16x16x128xbf16, #tpu.memory_space<vmem>>, vector<1x16x128xbf16>
    %387 = vector.shape_cast %386 : vector<1x16x128xbf16> to vector<16x128xbf16>
    %cst_127 = arith.constant dense<0.000000e+00> : vector<8x128xf32>
    %388 = tpu.matmul %385, %387, %cst_127 {dimension_numbers = #tpu.dot_dimension_numbers<[1], [0], [0], [1], [0, 0, 1, 1], [], []>} : vector<8x16xbf16>, vector<16x128xbf16>, vector<8x128xf32> -> vector<8x128xf32>
    %389 = arith.addf %362, %388 : vector<8x128xf32>
    %c112 = arith.constant 112 : index
    %c0_128 = arith.constant 0 : index
    %390 = vector.load %arg10[%c112, %c0_128] : memref<128x64xf32, #tpu.memory_space<vmem>>, vector<8x64xf32>
    %391 = arith.truncf %384 : vector<8x16xf32> to vector<8x16xbf16>
    %cst_129 = arith.constant dense<0.000000e+00> : vector<8x64xf32>
    %392 = tpu.matmul %391, %8, %cst_129 {dimension_numbers = #tpu.dot_dimension_numbers<[1], [0], [0], [1], [0, 0, 1, 1], [], []>} : vector<8x16xbf16>, vector<16x64xbf16>, vector<8x64xf32> -> vector<8x64xf32>
    %393 = arith.addf %390, %392 : vector<8x64xf32>
    %394 = arith.negf %393 : vector<8x64xf32>
    %395 = math.exp %394 : vector<8x64xf32>
    %cst_130 = arith.constant 1.000000e+00 : f32
    %396 = vector.broadcast %cst_130 : f32 to vector<8x64xf32>
    %397 = arith.addf %396, %395 : vector<8x64xf32>
    %398 = arith.divf %396, %397 : vector<8x64xf32>
    %399 = vector.extract_strided_slice %398 {offsets = [0, 0], sizes = [8, 16], strides = [1, 1]} : vector<8x64xf32> to vector<8x16xf32>
    %400 = vector.extract_strided_slice %398 {offsets = [0, 16], sizes = [8, 16], strides = [1, 1]} : vector<8x64xf32> to vector<8x16xf32>
    %401 = vector.extract_strided_slice %398 {offsets = [0, 32], sizes = [8, 16], strides = [1, 1]} : vector<8x64xf32> to vector<8x16xf32>
    %cst_131 = arith.constant 2.000000e+00 : f32
    %402 = vector.broadcast %cst_131 : f32 to vector<8x16xf32>
    %403 = arith.mulf %402, %401 : vector<8x16xf32>
    %cst_132 = arith.constant 1.000000e+00 : f32
    %404 = vector.broadcast %cst_132 : f32 to vector<8x16xf32>
    %405 = arith.subf %403, %404 : vector<8x16xf32>
    %406 = vector.extract_strided_slice %398 {offsets = [0, 48], sizes = [8, 16], strides = [1, 1]} : vector<8x64xf32> to vector<8x16xf32>
    %407 = arith.mulf %400, %382 : vector<8x16xf32>
    %408 = arith.mulf %399, %405 : vector<8x16xf32>
    %409 = arith.addf %407, %408 : vector<8x16xf32>
    %410 = math.tanh %409 : vector<8x16xf32>
    %411 = arith.mulf %406, %410 : vector<8x16xf32>
    %412 = arith.truncf %411 : vector<8x16xf32> to vector<8x16xbf16>
    %c14 = arith.constant 14 : index
    %c0_133 = arith.constant 0 : index
    %c0_134 = arith.constant 0 : index
    %413 = vector.load %arg5[%c14, %c0_133, %c0_134] : memref<16x16x128xbf16, #tpu.memory_space<vmem>>, vector<1x16x128xbf16>
    %414 = vector.shape_cast %413 : vector<1x16x128xbf16> to vector<16x128xbf16>
    %cst_135 = arith.constant dense<0.000000e+00> : vector<8x128xf32>
    %415 = tpu.matmul %412, %414, %cst_135 {dimension_numbers = #tpu.dot_dimension_numbers<[1], [0], [0], [1], [0, 0, 1, 1], [], []>} : vector<8x16xbf16>, vector<16x128xbf16>, vector<8x128xf32> -> vector<8x128xf32>
    %416 = arith.addf %389, %415 : vector<8x128xf32>
    %c120 = arith.constant 120 : index
    %c0_136 = arith.constant 0 : index
    %417 = vector.load %arg10[%c120, %c0_136] : memref<128x64xf32, #tpu.memory_space<vmem>>, vector<8x64xf32>
    %418 = arith.truncf %411 : vector<8x16xf32> to vector<8x16xbf16>
    %cst_137 = arith.constant dense<0.000000e+00> : vector<8x64xf32>
    %419 = tpu.matmul %418, %8, %cst_137 {dimension_numbers = #tpu.dot_dimension_numbers<[1], [0], [0], [1], [0, 0, 1, 1], [], []>} : vector<8x16xbf16>, vector<16x64xbf16>, vector<8x64xf32> -> vector<8x64xf32>
    %420 = arith.addf %417, %419 : vector<8x64xf32>
    %421 = arith.negf %420 : vector<8x64xf32>
    %422 = math.exp %421 : vector<8x64xf32>
    %cst_138 = arith.constant 1.000000e+00 : f32
    %423 = vector.broadcast %cst_138 : f32 to vector<8x64xf32>
    %424 = arith.addf %423, %422 : vector<8x64xf32>
    %425 = arith.divf %423, %424 : vector<8x64xf32>
    %426 = vector.extract_strided_slice %425 {offsets = [0, 0], sizes = [8, 16], strides = [1, 1]} : vector<8x64xf32> to vector<8x16xf32>
    %427 = vector.extract_strided_slice %425 {offsets = [0, 16], sizes = [8, 16], strides = [1, 1]} : vector<8x64xf32> to vector<8x16xf32>
    %428 = vector.extract_strided_slice %425 {offsets = [0, 32], sizes = [8, 16], strides = [1, 1]} : vector<8x64xf32> to vector<8x16xf32>
    %cst_139 = arith.constant 2.000000e+00 : f32
    %429 = vector.broadcast %cst_139 : f32 to vector<8x16xf32>
    %430 = arith.mulf %429, %428 : vector<8x16xf32>
    %cst_140 = arith.constant 1.000000e+00 : f32
    %431 = vector.broadcast %cst_140 : f32 to vector<8x16xf32>
    %432 = arith.subf %430, %431 : vector<8x16xf32>
    %433 = vector.extract_strided_slice %425 {offsets = [0, 48], sizes = [8, 16], strides = [1, 1]} : vector<8x64xf32> to vector<8x16xf32>
    %434 = arith.mulf %427, %409 : vector<8x16xf32>
    %435 = arith.mulf %426, %432 : vector<8x16xf32>
    %436 = arith.addf %434, %435 : vector<8x16xf32>
    %437 = math.tanh %436 : vector<8x16xf32>
    %438 = arith.mulf %433, %437 : vector<8x16xf32>
    %439 = arith.truncf %438 : vector<8x16xf32> to vector<8x16xbf16>
    %c15 = arith.constant 15 : index
    %c0_141 = arith.constant 0 : index
    %c0_142 = arith.constant 0 : index
    %440 = vector.load %arg5[%c15, %c0_141, %c0_142] : memref<16x16x128xbf16, #tpu.memory_space<vmem>>, vector<1x16x128xbf16>
    %441 = vector.shape_cast %440 : vector<1x16x128xbf16> to vector<16x128xbf16>
    %cst_143 = arith.constant dense<0.000000e+00> : vector<8x128xf32>
    %442 = tpu.matmul %439, %441, %cst_143 {dimension_numbers = #tpu.dot_dimension_numbers<[1], [0], [0], [1], [0, 0, 1, 1], [], []>} : vector<8x16xbf16>, vector<16x128xbf16>, vector<8x128xf32> -> vector<8x128xf32>
    %443 = arith.addf %416, %442 : vector<8x128xf32>
    %c0_144 = arith.constant 0 : index
    %c0_145 = arith.constant 0 : index
    %444 = vector.load %arg6[%c0_144, %c0_145] : memref<1x128xf32, #tpu.memory_space<vmem>>, vector<1x128xf32>
    %445 = vector.broadcast %444 : vector<1x128xf32> to vector<8x128xf32>
    %446 = arith.addf %443, %445 : vector<8x128xf32>
    %cst_146 = arith.constant 0.000000e+00 : f32
    %447 = vector.broadcast %cst_146 : f32 to vector<8x128xf32>
    %448 = arith.maximumf %446, %447 : vector<8x128xf32>
    %c0_147 = arith.constant 0 : index
    %c0_148 = arith.constant 0 : index
    %449 = vector.load %arg7[%c0_147, %c0_148] : memref<128x12xf32, #tpu.memory_space<vmem>>, vector<128x12xf32>
    %cst_149 = arith.constant dense<0.000000e+00> : vector<8x12xf32>
    %450 = tpu.matmul %448, %449, %cst_149 {dimension_numbers = #tpu.dot_dimension_numbers<[1], [0], [0], [1], [0, 0, 1, 1], [], []>} : vector<8x128xf32>, vector<128x12xf32>, vector<8x12xf32> -> vector<8x12xf32>
    %c0_150 = arith.constant 0 : index
    %c0_151 = arith.constant 0 : index
    %451 = vector.load %arg8[%c0_150, %c0_151] : memref<1x12xf32, #tpu.memory_space<vmem>>, vector<1x12xf32>
    %452 = vector.broadcast %451 : vector<1x12xf32> to vector<8x12xf32>
    %453 = arith.addf %450, %452 : vector<8x12xf32>
    %c0_152 = arith.constant 0 : index
    %c0_153 = arith.constant 0 : index
    %454 = vector.load %arg9[%c0_152, %c0_153] : memref<8x12xf32, #tpu.memory_space<vmem>>, vector<8x12xf32>
    tpu.vector_store %arg9[%c0_152, %c0_153], %453 {strides = array<i32>} : memref<8x12xf32, #tpu.memory_space<vmem>>, vector<8x12xf32>,
    return
  }
  func.func @transform_0(%arg0: i32) -> (i32, i32, i32) {
    %c0_i32 = arith.constant 0 : i32
    %c0_i32_0 = arith.constant 0 : i32
    %c0_i32_1 = arith.constant 0 : i32
    return %arg0, %c0_i32, %c0_i32_0 : i32, i32, i32
  }
  func.func @transform_1(%arg0: i32) -> (i32, i32) {
    %c0_i32 = arith.constant 0 : i32
    %c0_i32_0 = arith.constant 0 : i32
    %c0_i32_1 = arith.constant 0 : i32
    return %c0_i32, %c0_i32_0 : i32, i32
  }
  func.func @transform_2(%arg0: i32) -> (i32, i32) {
    %c0_i32 = arith.constant 0 : i32
    %c0_i32_0 = arith.constant 0 : i32
    %c0_i32_1 = arith.constant 0 : i32
    return %c0_i32, %c0_i32_0 : i32, i32
  }
  func.func @transform_3(%arg0: i32) -> (i32, i32) {
    %c0_i32 = arith.constant 0 : i32
    %c0_i32_0 = arith.constant 0 : i32
    %c0_i32_1 = arith.constant 0 : i32
    return %c0_i32, %c0_i32_0 : i32, i32
  }
  func.func @transform_4(%arg0: i32) -> (i32, i32, i32) {
    %c0_i32 = arith.constant 0 : i32
    %c0_i32_0 = arith.constant 0 : i32
    %c0_i32_1 = arith.constant 0 : i32
    %c0_i32_2 = arith.constant 0 : i32
    return %c0_i32, %c0_i32_0, %c0_i32_1 : i32, i32, i32
  }
  func.func @transform_5(%arg0: i32) -> (i32, i32) {
    %c0_i32 = arith.constant 0 : i32
    %c0_i32_0 = arith.constant 0 : i32
    %c0_i32_1 = arith.constant 0 : i32
    return %c0_i32, %c0_i32_0 : i32, i32
  }
  func.func @transform_6(%arg0: i32) -> (i32, i32) {
    %c0_i32 = arith.constant 0 : i32
    %c0_i32_0 = arith.constant 0 : i32
    %c0_i32_1 = arith.constant 0 : i32
    return %c0_i32, %c0_i32_0 : i32, i32
  }
  func.func @transform_7(%arg0: i32) -> (i32, i32) {
    %c0_i32 = arith.constant 0 : i32
    %c0_i32_0 = arith.constant 0 : i32
    %c0_i32_1 = arith.constant 0 : i32
    return %c0_i32, %c0_i32_0 : i32, i32
  }
  func.func @transform_8(%arg0: i32) -> (i32, i32) {
    %c0_i32 = arith.constant 0 : i32
    %c0_i32_0 = arith.constant 0 : i32
    return %arg0, %c0_i32 : i32, i32
  }
}

</mosaic_0001>

<bundles_post_ra>
// kernel: mul.17
= control target key start
LH: loop header
LB: loop body
LE: loop exit
PB: predicated region body
PF: predicated region fallthrough
CT: control target
= control target key end

     0   :  { %3 = vsyncpa [#allocation1], 0  ;;  %s46_s9 = smov [#allocation0]   ;;  %s80_s0 = inlined_call_operand.hbm [shape: f32[1,64], index: 0, kind: input, shape index: {}]   ;;  %s81_s1 = inlined_call_operand.vmem [shape: f32[1,64], index: 1, kind: input, shape index: {}]   ;;  %s82_s2 = inlined_call_operand.vmem [shape: f32[1,64], index: 2, kind: output, shape index: {}]  }
   0x1   :  { %s8_s10 = sshll.u32 %s46_s9, 4  ;;  %s22_s13 = scalar_lea.hbm %s80_s0, 16  ;;  %s9_s10 = int_to_ptr.vmem [resolvable:$true] %s8_s10 }
   0x2   :  { %p23_p0 = scmp.ne.s32.totalorder %s80_s0, %s22_s13  ;;  %p26_p1 = scmp.lt.u32.totalorder %s22_s13, %s80_s0 }
   0x4   :  { %p28_p2 = pnand %p26_p1, %p23_p0 }
   0x6   :  { %31 = shalt.err (!%p28_p2)
}
   0x7   :  { %s32_s18 = scalar_lea.vmem %s9_s10, 16  ;;  %s36_s19 = scalar_lea.vmem %s9_s10, 32 }
   0x8   :  { %p33_p3 = scmp.ne.s32.totalorder %s9_s10, %s32_s18  ;;  %p37_p4 = scmp.lt.s32.totalorder %s9_s10, %s9_s10 }
   0x9   :  { %p38_p5 = scmp.lt.s32.totalorder %s36_s19, %s32_s18 }
   0xb   :  { %p39_p6 = por %p38_p5, %p37_p4 }
   0xd   :  { %p40_p7 = pnand %p39_p6, %p33_p3 }
   0xf   :  { %43 = shalt.err (!%p40_p7)
}
  0x10   :  { %11 = dma.hbm_to_vmem [thread:$0]  %s80_s0, 16, %s9_s10, [#allocation1]  }
  0x11   :  { %44 = dma.done.wait [#allocation1], 16  }
  0x12   :  { %45 = vsyncadd [#allocation1], 4294967280  ;;  %v13_v0 = vld [vmem:[#allocation0] sm:$0x1] }
  0x13   :  { %v14_v1 = vld [vmem:[%s81_s1] sm:$0x1] }
  0x14   :  { %v17_v2 = vmul.f32 %v14_v1, %v13_v0 }
  0x16   :  { %19 = vst [vmem:[%s82_s2] sm:$0x1] %v17_v2 }
  0x17   :  { %20 = vsyncpa [#allocation1], 1 }

// kernel: lstm_net_forward.1
= control target key start
LH: loop header
LB: loop body
LE: loop exit
PB: predicated region body
PF: predicated region fallthrough
CT: control target
= control target key end

     0   :  { %vm120_vm0 = vcmask 1043456   ;;  %vm95_vm1 = vcmask 64512   ;;  %v2996_v5 = vmov 0.0   ;;  %vm2997_vm2 = vmmov 0   ;;  %s3465_s0 = inlined_call_operand.vmem [shape: bf16[1,128,8], index: 0, kind: input, shape index: {}]   ;;  %s3466_s1 = inlined_call_operand.vmem [shape: bf16[8,64], index: 1, kind: input, shape index: {}]   ;;  %s3467_s2 = inlined_call_operand.vmem [shape: bf16[16,64], index: 2, kind: input, shape index: {}]   ;;  %s3468_s3 = inlined_call_operand.vmem [shape: f32[1,64], index: 3, kind: input, shape index: {}]   ;;  %s3469_s4 = inlined_call_operand.vmem [shape: bf16[16,16,128], index: 4, kind: input, shape index: {}]   ;;  %s3470_s5 = inlined_call_operand.vmem [shape: f32[1,128], index: 5, kind: input, shape index: {}]   ;;  %s3471_s6 = inlined_call_operand.vmem [shape: f32[128,12], index: 6, kind: input, shape index: {}]   ;;  %s3472_s7 = inlined_call_operand.vmem [shape: f32[1,12], index: 7, kind: input, shape index: {}]   ;;  %s3473_s8 = inlined_call_operand.hbm [shape: f32[8,12], index: 8, kind: output, shape index: {}]  }
   0x1   :  { %v47_v0 = vld [vmem:[%s3466_s1] sm:$0xf]  ;;  %v2851_v3 = vld [vmem:[%s3465_s0 + $0x30] sm:$0xff]   ;;  %v2852_v4 = vld [vmem:[%s3465_s0 + $0x8] sm:$0xff]   ;;  %v2998_v8 = vmov 0  }
   0x2   :  { %v2850_v1 = vld [vmem:[%s3465_s0] sm:$0xff]   ;;  %2839 = vmatprep.subr.msk.bf16.mxu0 %vm120_vm0, %v47_v0  ;;  %2840 = vmatprep.subr.msk.bf16.mxu1 %vm120_vm0, %v47_v0  ;;  %v122_v2 = vsel %vm120_vm0, %v47_v0, 0  ;;  %v2853_v6 = vld [vmem:[%s3465_s0 + $0x38] sm:$0xff]  }
   0x3   :  { %2569 = vmatpush3.bf16.msra.mxu0 %v122_v2  ;;  %2838 = vmatpush3.bf16.msra.mxu1 %v122_v2  ;;  %v3073_v7 = vld [vmem:[%s3467_s2] sm:$0xff]  }
   0x4   :  { %2570 = vmatprep.mubr.msk.bf16.mxu0 %vm95_vm1, %v2850_v1  ;;  %2586 = vmatprep.subr.bf16.mxu1 %v2996_v5 }
   0x5   :  { %2582 = vmatprep.mubr.msk.bf16.mxu1 %vm95_vm1, %v2851_v3  ;;  %2622 = vmatprep.subr.bf16.mxu0 %v2996_v5 }
   0x6   :  { %2571 = vmatmul.mubr.msk.bf16.vlgmr.msra.gmra.mrb[0].mxu0 %vm95_vm1, %v2852_v4  ;;  %2583 = vmatmul.mubr.msk.bf16.vlgmr.msra.gmra.mrb[0].mxu1 %vm95_vm1, %v2853_v6 }
   0x7   :  { %2587 = vmatpush3.bf16.msra.mxu1 %v3073_v7  ;;  %2588 = vmatprep.mubr.msk.bf16.mxu1 %vm2997_vm2, %v2996_v5 }
   0x8   :  { %2592 = vmatprep.subr.bf16.mxu1 %v2996_v5  ;;  %2623 = vmatpush3.bf16.msra.mxu0 %v3073_v7 }
   0x9   :  { %2634 = vmatprep.subr.bf16.mxu0 %v2996_v5 }
   0xe   :  { %2589 = vmatmul.mubr.bf16.vlgmr.msra.gmra.mrb[4].mxu1 %v2998_v8 }
   0xf   :  { %2593 = vmatpush3.bf16.msra.mxu1 %v3073_v7  ;;  %2594 = vmatprep.mubr.msk.bf16.mxu1 %vm2997_vm2, %v2996_v5 }
  0x10   :  { %2598 = vmatprep.subr.bf16.mxu1 %v2996_v5 }
  0x11   :  { %13 = vsyncpa [#allocation4], 0  ;;  %v3089_v9 = vld [vmem:[%s3468_s3] ss:$0 sm:$0xff]  ;;  %vm221_vm3 = vcmask 523264   ;;  %s2999_s3 = smov 96  }
  0x12   :  { %s3000_s18 = smov 16   ;;  %s3001_s19 = smov 32   ;;  %vm247_vm4 = vcmask 130048   ;;  %v2855_v1 = vld [vmem:[%s3469_s4 + $0x8] sm:$0xff]   ;;  %v2856_v8 = vld [vmem:[%s3469_s4] sm:$0xff]   ;;  %vm2333_vm5 = vcmask 97280  }
  0x13   :  { %s3002_s20 = smov 80  }
  0xd9   :  { %v2572_v10 = vpop.f32.mrb[0].mxu0  ;;  %v2584_v12 = vpop.f32.mrb[0].mxu1 }
  0xda   :  { %v167_v11 = vadd.f32 %v2572_v10, %v3089_v9  ;;  %v158_v13 = vpop.f32.mrb[1].mxu0  ;;  %v215_v14 = vadd.f32 %v2584_v12, %v3089_v9  ;;  %v206_v16 = vpop.f32.mrb[1].mxu1 }
  0xdb   :  { %v159_v15 = vadd.f32 %v3089_v9, %v158_v13  ;;  %v2573_v17 = vpop.f32.mrb[2].mxu0  ;;  %v207_v18 = vadd.f32 %v3089_v9, %v206_v16  ;;  %v2585_v20 = vpop.f32.mrb[2].mxu1 }
  0xdc   :  { %224 = vst.msk [vmem:[#allocation2 + $0x10] sm:$0xff] %vm221_vm3, %v167_v11  ;;  %v170_v19 = vadd.f32 %v2573_v17, %v3089_v9  ;;  %v161_v21 = vpop.f32.mrb[3].mxu0  ;;  %236 = vst.msk [vmem:[#allocation2 + $0x70] sm:$0xff] %vm221_vm3, %v215_v14  ;;  %v218_v22 = vadd.f32 %v2585_v20, %v3089_v9  ;;  %v209_v24 = vpop.f32.mrb[3].mxu1 }
  0xdd   :  { %222 = vst.msk [vmem:[#allocation2] sm:$0xff] %vm221_vm3, %v159_v15  ;;  %v162_v23 = vadd.f32 %v3089_v9, %v161_v21  ;;  %234 = vst.msk [vmem:[#allocation2 + $0x60] sm:$0xff] %vm221_vm3, %v207_v18  ;;  %v210_v25 = vadd.f32 %v3089_v9, %v209_v24 }
  0xde   :  { %225 = vst.msk [vmem:[#allocation2 + $0x18] sm:$0xff] %vm221_vm3, %v170_v19  ;;  %237 = vst.msk [vmem:[#allocation2 + $0x78] sm:$0xff] %vm221_vm3, %v218_v22 }
  0xdf   :  { %223 = vst.msk [vmem:[#allocation2 + $0x8] sm:$0xff] %vm221_vm3, %v162_v23  ;;  %235 = vst.msk [vmem:[#allocation2 + $0x68] sm:$0xff] %vm221_vm3, %v210_v25 }
  0xe1   :  { %v285_v26 = vpop.f32.mrb[4].mxu1 }
  0xe2   :  { %v2590_v27 = vpop.f32.mrb[5].mxu1 }
  0xe3   :  { %v288_v29 = vpop.f32.mrb[6].mxu1  ;;  %v495_v20 = vld [vmem:[#allocation2 + $0x10] sm:$0xff] }
  0xe4   :  { %v240_v28 = vld [vmem:[#allocation2] sm:$0xff]  ;;  %v2591_v31 = vpop.f32.mrb[7].mxu1 }
  0xe5   :  { %v291_v30 = vadd.f32 %v285_v26, %v240_v28 }
  0xe6   :  { %v320_v48 = vld [vmem:[#allocation2 + $0x8] sm:$0xff] }
  0xe7   :  { %v2367_v32 = vmul.f32 -1.442695, %v291_v30 }
  0xe9   :  { %2875 = vpow2.f32 %v2367_v32 }
  0xf3   :  { %v2876_v33 = vpop.eup %2875 }
  0xf4   :  { %v295_v34 = vadd.f32 1.0, %v2876_v33 }
  0xf6   :  { %2877 = vrcp.f32 %v295_v34 }
 0x100   :  { %v2878_v35 = vpop.eup %2877 }
 0x101   :  { %v298_v36 = vmul.f32 2.0, %v2878_v35  ;;  %v300_v40 = vmul.f32 0.0, %v2878_v35 }
 0x103   :  { %v2368_v37 = vadd.f32 -1.0, %v298_v36 }
 0x105   :  { %302 = vrot.lane.b32.xlu0 %v2368_v37, %s2999_s3  ;;  %v2857_v37 = vld [vmem:[%s3465_s0 + $0x10] sm:$0xff]  }
 0x106   :  { %2574 = vmatprep.mubr.msk.bf16.mxu0 %vm95_vm1, %v2857_v37 }
 0x177   :  { %v303_v38 = vpop.permute.xlu0 %302 }
 0x178   :  { %v305_v39 = vmul.f32 %v2878_v35, %v303_v38  ;;  %v2858_v38 = vld [vmem:[%s3465_s0 + $0x18] sm:$0xff]  }
 0x179   :  { %2575 = vmatmul.mubr.msk.bf16.gmra.mrb[4].mxu0 %vm95_vm1, %v2858_v38 }
 0x17a   :  { %307 = vrot.lane.b32.xlu0 %v305_v39, %s3000_s18  ;;  %v2859_v39 = vld [vmem:[%s3465_s0 + $0x20] sm:$0xff]  }
 0x17b   :  { %2578 = vmatprep.mubr.msk.bf16.mxu0 %vm95_vm1, %v2859_v39 }
 0x1ec   :  { %v308_v41 = vpop.permute.xlu0 %307 }
 0x1ed   :  { %v310_v42 = vadd.f32 %v308_v41, %v300_v40  ;;  %v2861_v40 = vld [vmem:[%s3469_s4 + $0x10] sm:$0xff]   ;;  %v2860_v41 = vld [vmem:[%s3465_s0 + $0x28] sm:$0xff]  }
 0x1ee   :  { %2579 = vmatmul.mubr.msk.bf16.gmra.mrb[8].mxu0 %vm95_vm1, %v2860_v41 }
 0x1ef   :  { %2879 = vtanh.f32 %v310_v42  ;;  %2624 = vmatprep.mubr.msk.bf16.mxu0 %vm2997_vm2, %v2996_v5 }
 0x1f9   :  { %v2880_v43 = vpop.eup %2879 }
 0x1fa   :  { %313 = vrot.lane.b32.xlu1 %v2880_v43, %s3001_s19 }
 0x26c   :  { %v314_v44 = vpop.permute.xlu1 %313 }
 0x26d   :  { %v316_v45 = vmul.f32 %v2878_v35, %v314_v44 }
 0x26f   :  { %v317_v46 = vpack.c.bf16 %v316_v45, %v316_v45 }
 0x271   :  { %322 = vrot.lane.b32.xlu1 %v317_v46, %s3002_s20  ;;  %v2576_v46 = vpop.f32.mrb[4].mxu0 }
 0x2e3   :  { %v323_v47 = vpop.permute.xlu1 %322 }
 0x2e4   :  { %2595 = vmatmul.mubr.msk.bf16.vlgmr.msra.gmra.mrb[8].mxu1 %vm247_vm4, %v323_v47 }
 0x2e5   :  { %2600 = vmatprep.mubr.msk.bf16.mxu1 %vm2997_vm2, %v2996_v5  ;;  %2599 = vmatpush3.bf16.msra.mxu1 %v2855_v1 }
 0x2e6   :  { %2604 = vmatprep.subr.bf16.mxu1 %v2996_v5 }
 0x3b7   :  { %v361_v49 = vpop.f32.mrb[8].mxu1 }
 0x3b8   :  { %v367_v50 = vadd.f32 %v361_v49, %v320_v48  ;;  %v2596_v51 = vpop.f32.mrb[9].mxu1  ;;  %v174_v48 = vpop.f32.mrb[5].mxu0 }
 0x3b9   :  { %v364_v52 = vpop.f32.mrb[10].mxu1  ;;  %v175_v49 = vadd.f32 %v3089_v9, %v174_v48 }
 0x3ba   :  { %v2370_v53 = vmul.f32 -1.442695, %v367_v50  ;;  %v2597_v54 = vpop.f32.mrb[11].mxu1  ;;  %v2577_v50 = vpop.f32.mrb[6].mxu0 }
 0x3bb   :  { %v186_v51 = vadd.f32 %v2577_v50, %v3089_v9  ;;  %v177_v52 = vpop.f32.mrb[7].mxu0  ;;  %226 = vst.msk [vmem:[#allocation2 + $0x20] sm:$0xff] %vm221_vm3, %v175_v49 }
 0x3bc   :  { %2881 = vpow2.f32 %v2370_v53  ;;  %v178_v53 = vadd.f32 %v3089_v9, %v177_v52  ;;  %v2580_v54 = vpop.f32.mrb[8].mxu0 }
 0x3bd   :  { %229 = vst.msk [vmem:[#allocation2 + $0x38] sm:$0xff] %vm221_vm3, %v186_v51  ;;  %v2863_v51 = vld [vmem:[%s3469_s4 + $0x20] sm:$0xff]  }
 0x3be   :  { %227 = vst.msk [vmem:[#allocation2 + $0x28] sm:$0xff] %vm221_vm3, %v178_v53 }
 0x3c6   :  { %v2882_v55 = vpop.eup %2881 }
 0x3c7   :  { %v371_v56 = vadd.f32 1.0, %v2882_v55  ;;  %v199_v55 = vadd.f32 %v2580_v54, %v3089_v9 }
 0x3c9   :  { %2883 = vrcp.f32 %v371_v56  ;;  %v190_v56 = vpop.f32.mrb[9].mxu0  ;;  %232 = vst.msk [vmem:[#allocation2 + $0x50] sm:$0xff] %vm221_vm3, %v199_v55 }
 0x3d3   :  { %v2884_v57 = vpop.eup %2883 }
 0x3d4   :  { %v374_v58 = vmul.f32 2.0, %v2884_v57  ;;  %v376_v62 = vmul.f32 %v2884_v57, %v310_v42 }
 0x3d6   :  { %v2371_v59 = vadd.f32 -1.0, %v374_v58  ;;  %v2581_v58 = vpop.f32.mrb[10].mxu0 }
 0x3d8   :  { %378 = vrot.lane.b32.xlu0 %v2371_v59, %s2999_s3  ;;  %v202_v59 = vadd.f32 %v2581_v58, %v3089_v9  ;;  %v867_v58 = vld [vmem:[#allocation2 + $0x28] sm:$0xff] }
 0x3da   :  { %233 = vst.msk [vmem:[#allocation2 + $0x58] sm:$0xff] %vm221_vm3, %v202_v59 }
 0x44a   :  { %v379_v60 = vpop.permute.xlu0 %378 }
 0x44b   :  { %v381_v61 = vmul.f32 %v2884_v57, %v379_v60  ;;  %v193_v60 = vpop.f32.mrb[11].mxu0 }
 0x44d   :  { %383 = vrot.lane.b32.xlu1 %v381_v61, %s3000_s18  ;;  %v194_v61 = vadd.f32 %v3089_v9, %v193_v60 }
 0x44f   :  { %231 = vst.msk [vmem:[#allocation2 + $0x48] sm:$0xff] %vm221_vm3, %v194_v61 }
 0x4bf   :  { %v384_v63 = vpop.permute.xlu1 %383 }
 0x4c0   :  { %v386_v0 = vadd.f32 %v384_v63, %v376_v62  ;;  %v619_v63 = vld [vmem:[#allocation2 + $0x18] sm:$0xff] }
 0x4c2   :  { %2885 = vtanh.f32 %v386_v0 }
 0x4cc   :  { %v2886_v2 = vpop.eup %2885 }
 0x4cd   :  { %389 = vrot.lane.b32.xlu0 %v2886_v2, %s3001_s19 }
 0x53f   :  { %v390_v3 = vpop.permute.xlu0 %389 }
 0x540   :  { %v392_v4 = vmul.f32 %v2884_v57, %v390_v3  ;;  %v191_v57 = vadd.f32 %v3089_v9, %v190_v56 }
 0x542   :  { %v393_v6 = vpack.c.bf16 %v392_v4, %v392_v4  ;;  %230 = vst.msk [vmem:[#allocation2 + $0x40] sm:$0xff] %vm221_vm3, %v191_v57 }
 0x544   :  { %398 = vrot.lane.b32.xlu1 %v393_v6, %s3002_s20 }
 0x5b6   :  { %v399_v10 = vpop.permute.xlu1 %398 }
 0x5b7   :  { %2601 = vmatmul.mubr.msk.bf16.vlgmr.msra.gmra.mrb[12].mxu1 %vm247_vm4, %v399_v10 }
 0x5b8   :  { %2605 = vmatpush3.bf16.msra.mxu1 %v2856_v8  ;;  %2606 = vmatprep.mubr.msk.bf16.mxu1 %vm2997_vm2, %v2996_v5 }
 0x5b9   :  { %2610 = vmatprep.subr.bf16.mxu1 %v2996_v5 }
 0x5bf   :  { %2607 = vmatmul.mubr.msk.bf16.vlgmr.msra.gmra.mrb[16].mxu1 %vm247_vm4, %v323_v47  ;;  %v183_v47 = vadd.f32 %v2576_v46, %v3089_v9 }
 0x5c0   :  { %2611 = vmatpush3.bf16.msra.mxu1 %v3073_v7  ;;  %2612 = vmatprep.mubr.msk.bf16.mxu1 %vm2997_vm2, %v2996_v5 }
 0x5c1   :  { %2616 = vmatprep.subr.bf16.mxu1 %v2996_v5  ;;  %228 = vst.msk [vmem:[#allocation2 + $0x30] sm:$0xff] %vm221_vm3, %v183_v47 }
 0x5c7   :  { %2613 = vmatmul.mubr.msk.bf16.vlgmr.msra.gmra.mrb[20].mxu1 %vm247_vm4, %v399_v10 }
 0x5c8   :  { %2618 = vmatprep.mubr.msk.bf16.mxu1 %vm2997_vm2, %v2996_v5  ;;  %2617 = vmatpush3.bf16.msra.mxu1 %v2861_v40 }
 0x5c9   :  { %2628 = vmatprep.subr.bf16.mxu1 %v2996_v5 }
 0x68a   :  { %v443_v11 = vpop.f32.mrb[12].mxu1 }
 0x68b   :  { %v2602_v12 = vpop.f32.mrb[13].mxu1 }
 0x68c   :  { %v446_v13 = vpop.f32.mrb[14].mxu1 }
 0x68d   :  { %v2603_v14 = vpop.f32.mrb[15].mxu1 }
 0x692   :  { %v489_v15 = vpop.f32.mrb[16].mxu1 }
 0x693   :  { %v3137_v16 = vadd.f32 %v489_v15, %v443_v11  ;;  %v2608_v17 = vpop.f32.mrb[17].mxu1 }
 0x694   :  { %v492_v18 = vpop.f32.mrb[18].mxu1 }
 0x695   :  { %v2609_v19 = vpop.f32.mrb[19].mxu1 }
 0x69a   :  { %v530_v21 = vpop.f32.mrb[20].mxu1 }
 0x69b   :  { %v536_v22 = vadd.f32 %v530_v21, %v495_v20  ;;  %v2614_v23 = vpop.f32.mrb[21].mxu1 }
 0x69c   :  { %v533_v24 = vpop.f32.mrb[22].mxu1  ;;  %v2862_v23 = vld [vmem:[%s3469_s4 + $0x18] sm:$0xff]  }
 0x69d   :  { %v2379_v25 = vmul.f32 -1.442695, %v536_v22  ;;  %v2615_v26 = vpop.f32.mrb[23].mxu1 }
 0x69f   :  { %2887 = vpow2.f32 %v2379_v25 }
 0x6a9   :  { %v2888_v27 = vpop.eup %2887 }
 0x6aa   :  { %v540_v28 = vadd.f32 1.0, %v2888_v27 }
 0x6ac   :  { %2889 = vrcp.f32 %v540_v28 }
 0x6b6   :  { %v2890_v29 = vpop.eup %2889 }
 0x6b7   :  { %v543_v30 = vmul.f32 2.0, %v2890_v29  ;;  %v545_v34 = vmul.f32 %v2890_v29, %v386_v0 }
 0x6b9   :  { %v2380_v31 = vadd.f32 -1.0, %v543_v30  ;;  %v743_v30 = vld [vmem:[#allocation2 + $0x20] sm:$0xff] }
 0x6bb   :  { %547 = vrot.lane.b32.xlu0 %v2380_v31, %s2999_s3 }
 0x72d   :  { %v548_v32 = vpop.permute.xlu0 %547 }
 0x72e   :  { %v550_v33 = vmul.f32 %v2890_v29, %v548_v32 }
 0x730   :  { %552 = vrot.lane.b32.xlu1 %v550_v33, %s3000_s18 }
 0x7a2   :  { %v553_v35 = vpop.permute.xlu1 %552 }
 0x7a3   :  { %v3141_v36 = vadd.f32 %v553_v35, %v545_v34 }
 0x7a5   :  { %2891 = vtanh.f32 %v3141_v36 }
 0x7af   :  { %v2892_v42 = vpop.eup %2891 }
 0x7b0   :  { %558 = vrot.lane.b32.xlu0 %v2892_v42, %s3001_s19 }
 0x822   :  { %v559_v43 = vpop.permute.xlu0 %558 }
 0x823   :  { %v561_v44 = vmul.f32 %v2890_v29, %v559_v43 }
 0x825   :  { %v562_v45 = vpack.c.bf16 %v561_v44, %v561_v44 }
 0x827   :  { %567 = vrot.lane.b32.xlu1 %v562_v45, %s3002_s20 }
 0x899   :  { %v568_v62 = vpop.permute.xlu1 %567 }
 0x89a   :  { %2619 = vmatmul.mubr.msk.bf16.vlgmr.msra.gmra.mrb[24].mxu1 %vm247_vm4, %v568_v62  ;;  %2625 = vmatmul.mubr.msk.bf16.vlgmr.msra.gmra.mrb[12].mxu0 %vm247_vm4, %v568_v62 }
 0x89b   :  { %2635 = vmatpush3.bf16.msra.mxu0 %v3073_v7  ;;  %2636 = vmatprep.mubr.msk.bf16.mxu0 %vm2997_vm2, %v2996_v5 }
 0x89c   :  { %2630 = vmatprep.mubr.msk.bf16.mxu1 %vm2997_vm2, %v2996_v5  ;;  %2646 = vmatprep.subr.bf16.mxu0 %v2996_v5 }
 0x89d   :  { %2629 = vmatpush3.bf16.msra.mxu1 %v2862_v23 }
 0x89e   :  { %2640 = vmatprep.subr.bf16.mxu1 %v2996_v5 }
 0x96d   :  { %v612_v9 = vpop.f32.mrb[24].mxu1  ;;  %v654_v0 = vpop.f32.mrb[12].mxu0 }
 0x96e   :  { %v618_v1 = vadd.f32 %v612_v9, %v3137_v16  ;;  %v660_v2 = vadd.f32 %v654_v0, %v619_v63  ;;  %v2620_v3 = vpop.f32.mrb[25].mxu1  ;;  %v2626_v4 = vpop.f32.mrb[13].mxu0 }
 0x96f   :  { %v615_v6 = vpop.f32.mrb[26].mxu1  ;;  %v657_v8 = vpop.f32.mrb[14].mxu0 }
 0x970   :  { %v2386_v10 = vmul.f32 -1.442695, %v660_v2  ;;  %v2621_v11 = vpop.f32.mrb[27].mxu1  ;;  %v2627_v12 = vpop.f32.mrb[15].mxu0 }
 0x972   :  { %2893 = vpow2.f32 %v2386_v10 }
 0x97c   :  { %v2894_v13 = vpop.eup %2893 }
 0x97d   :  { %v664_v14 = vadd.f32 1.0, %v2894_v13 }
 0x97f   :  { %2895 = vrcp.f32 %v664_v14 }
 0x989   :  { %v2896_v15 = vpop.eup %2895 }
 0x98a   :  { %v667_v17 = vmul.f32 2.0, %v2896_v15  ;;  %v669_v16 = vmul.f32 %v2896_v15, %v3141_v36 }
 0x98c   :  { %v2387_v18 = vadd.f32 -1.0, %v667_v17 }
 0x98e   :  { %671 = vrot.lane.b32.xlu0 %v2387_v18, %s2999_s3  ;;  %v2864_v18 = vld [vmem:[%s3469_s4 + $0x28] sm:$0xff]  }
 0xa00   :  { %v672_v19 = vpop.permute.xlu0 %671 }
 0xa01   :  { %v674_v20 = vmul.f32 %v2896_v15, %v672_v19 }
 0xa03   :  { %676 = vrot.lane.b32.xlu1 %v674_v20, %s3000_s18 }
 0xa75   :  { %v677_v21 = vpop.permute.xlu1 %676 }
 0xa76   :  { %v679_v22 = vadd.f32 %v677_v21, %v669_v16 }
 0xa78   :  { %2897 = vtanh.f32 %v679_v22 }
 0xa82   :  { %v2898_v24 = vpop.eup %2897 }
 0xa83   :  { %682 = vrot.lane.b32.xlu0 %v2898_v24, %s3001_s19  ;;  %v991_v24 = vld [vmem:[#allocation2 + $0x30] sm:$0xff] }
 0xaf5   :  { %v683_v25 = vpop.permute.xlu0 %682 }
 0xaf6   :  { %v685_v26 = vmul.f32 %v2896_v15, %v683_v25 }
 0xaf8   :  { %v686_v27 = vpack.c.bf16 %v685_v26, %v685_v26 }
 0xafa   :  { %691 = vrot.lane.b32.xlu1 %v686_v27, %s3002_s20 }
 0xb6c   :  { %v692_v28 = vpop.permute.xlu1 %691 }
 0xb6d   :  { %2631 = vmatmul.mubr.msk.bf16.vlgmr.msra.gmra.mrb[28].mxu1 %vm247_vm4, %v692_v28  ;;  %2637 = vmatmul.mubr.msk.bf16.vlgmr.msra.gmra.mrb[16].mxu0 %vm247_vm4, %v692_v28 }
 0xb6e   :  { %2647 = vmatpush3.bf16.msra.mxu0 %v3073_v7  ;;  %2648 = vmatprep.mubr.msk.bf16.mxu0 %vm2997_vm2, %v2996_v5 }
 0xb6f   :  { %2642 = vmatprep.mubr.msk.bf16.mxu1 %vm2997_vm2, %v2996_v5  ;;  %2658 = vmatprep.subr.bf16.mxu0 %v2996_v5 }
 0xb70   :  { %2641 = vmatpush3.bf16.msra.mxu1 %v2863_v51 }
 0xb71   :  { %2652 = vmatprep.subr.bf16.mxu1 %v2996_v5 }
 0xc40   :  { %v736_v29 = vpop.f32.mrb[28].mxu1  ;;  %v778_v31 = vpop.f32.mrb[16].mxu0 }
 0xc41   :  { %v742_v32 = vadd.f32 %v736_v29, %v618_v1  ;;  %v784_v33 = vadd.f32 %v778_v31, %v743_v30  ;;  %v2632_v34 = vpop.f32.mrb[29].mxu1  ;;  %v2638_v35 = vpop.f32.mrb[17].mxu0 }
 0xc42   :  { %v739_v36 = vpop.f32.mrb[30].mxu1  ;;  %v781_v37 = vpop.f32.mrb[18].mxu0 }
 0xc43   :  { %v2393_v38 = vmul.f32 -1.442695, %v784_v33  ;;  %v2633_v39 = vpop.f32.mrb[31].mxu1  ;;  %v2639_v40 = vpop.f32.mrb[19].mxu0 }
 0xc45   :  { %2899 = vpow2.f32 %v2393_v38 }
 0xc4f   :  { %v2900_v41 = vpop.eup %2899 }
 0xc50   :  { %v788_v42 = vadd.f32 1.0, %v2900_v41 }
 0xc52   :  { %2901 = vrcp.f32 %v788_v42 }
 0xc5c   :  { %v2902_v43 = vpop.eup %2901 }
 0xc5d   :  { %v791_v44 = vmul.f32 2.0, %v2902_v43  ;;  %v793_v48 = vmul.f32 %v2902_v43, %v679_v22 }
 0xc5f   :  { %v2394_v45 = vadd.f32 -1.0, %v791_v44 }
 0xc61   :  { %795 = vrot.lane.b32.xlu0 %v2394_v45, %s2999_s3  ;;  %v2865_v45 = vld [vmem:[%s3469_s4 + $0x30] sm:$0xff]  }
 0xcd3   :  { %v796_v46 = vpop.permute.xlu0 %795 }
 0xcd4   :  { %v798_v47 = vmul.f32 %v2902_v43, %v796_v46 }
 0xcd6   :  { %800 = vrot.lane.b32.xlu1 %v798_v47, %s3000_s18 }
 0xd48   :  { %v801_v49 = vpop.permute.xlu1 %800 }
 0xd49   :  { %v803_v50 = vadd.f32 %v801_v49, %v793_v48 }
 0xd4b   :  { %2903 = vtanh.f32 %v803_v50 }
 0xd55   :  { %v2904_v52 = vpop.eup %2903 }
 0xd56   :  { %806 = vrot.lane.b32.xlu0 %v2904_v52, %s3001_s19  ;;  %v1115_v52 = vld [vmem:[#allocation2 + $0x38] sm:$0xff] }
 0xdc8   :  { %v807_v53 = vpop.permute.xlu0 %806 }
 0xdc9   :  { %v809_v54 = vmul.f32 %v2902_v43, %v807_v53 }
 0xdcb   :  { %v810_v55 = vpack.c.bf16 %v809_v54, %v809_v54 }
 0xdcd   :  { %815 = vrot.lane.b32.xlu1 %v810_v55, %s3002_s20 }
 0xe3f   :  { %v816_v56 = vpop.permute.xlu1 %815 }
 0xe40   :  { %2643 = vmatmul.mubr.msk.bf16.vlgmr.msra.gmra.mrb[32].mxu1 %vm247_vm4, %v816_v56  ;;  %2649 = vmatmul.mubr.msk.bf16.vlgmr.msra.gmra.mrb[20].mxu0 %vm247_vm4, %v816_v56 }
 0xe41   :  { %2659 = vmatpush3.bf16.msra.mxu0 %v3073_v7  ;;  %2660 = vmatprep.mubr.msk.bf16.mxu0 %vm2997_vm2, %v2996_v5 }
 0xe42   :  { %2654 = vmatprep.mubr.msk.bf16.mxu1 %vm2997_vm2, %v2996_v5  ;;  %2670 = vmatprep.subr.bf16.mxu0 %v2996_v5 }
 0xe43   :  { %2653 = vmatpush3.bf16.msra.mxu1 %v2864_v18 }
 0xe44   :  { %2664 = vmatprep.subr.bf16.mxu1 %v2996_v5 }
 0xf13   :  { %v860_v57 = vpop.f32.mrb[32].mxu1  ;;  %v902_v59 = vpop.f32.mrb[20].mxu0 }
 0xf14   :  { %v866_v60 = vadd.f32 %v860_v57, %v742_v32  ;;  %v908_v61 = vadd.f32 %v902_v59, %v867_v58  ;;  %v2644_v62 = vpop.f32.mrb[33].mxu1  ;;  %v2650_v9 = vpop.f32.mrb[21].mxu0 }
 0xf15   :  { %v863_v63 = vpop.f32.mrb[34].mxu1  ;;  %v905_v0 = vpop.f32.mrb[22].mxu0 }
 0xf16   :  { %v2400_v1 = vmul.f32 -1.442695, %v908_v61  ;;  %v2645_v2 = vpop.f32.mrb[35].mxu1  ;;  %v2651_v3 = vpop.f32.mrb[23].mxu0 }
 0xf18   :  { %2905 = vpow2.f32 %v2400_v1 }
 0xf22   :  { %v2906_v4 = vpop.eup %2905 }
 0xf23   :  { %v912_v6 = vadd.f32 1.0, %v2906_v4 }
 0xf25   :  { %2907 = vrcp.f32 %v912_v6 }
 0xf2f   :  { %v2908_v8 = vpop.eup %2907 }
 0xf30   :  { %v915_v10 = vmul.f32 2.0, %v2908_v8  ;;  %v917_v14 = vmul.f32 %v2908_v8, %v803_v50 }
 0xf32   :  { %v2401_v11 = vadd.f32 -1.0, %v915_v10 }
 0xf34   :  { %919 = vrot.lane.b32.xlu0 %v2401_v11, %s2999_s3  ;;  %v2866_v11 = vld [vmem:[%s3469_s4 + $0x38] sm:$0xff]  }
 0xfa6   :  { %v920_v12 = vpop.permute.xlu0 %919 }
 0xfa7   :  { %v922_v13 = vmul.f32 %v2908_v8, %v920_v12 }
 0xfa9   :  { %924 = vrot.lane.b32.xlu1 %v922_v13, %s3000_s18 }
0x101b   :  { %v925_v15 = vpop.permute.xlu1 %924 }
0x101c   :  { %v927_v17 = vadd.f32 %v925_v15, %v917_v14 }
0x101e   :  { %2909 = vtanh.f32 %v927_v17 }
0x1028   :  { %v2910_v19 = vpop.eup %2909 }
0x1029   :  { %930 = vrot.lane.b32.xlu0 %v2910_v19, %s3001_s19  ;;  %v1239_v19 = vld [vmem:[#allocation2 + $0x40] sm:$0xff] }
0x109b   :  { %v931_v20 = vpop.permute.xlu0 %930 }
0x109c   :  { %v933_v16 = vmul.f32 %v2908_v8, %v931_v20 }
0x109e   :  { %v934_v21 = vpack.c.bf16 %v933_v16, %v933_v16 }
0x10a0   :  { %939 = vrot.lane.b32.xlu1 %v934_v21, %s3002_s20 }
0x1112   :  { %v940_v22 = vpop.permute.xlu1 %939 }
0x1113   :  { %2655 = vmatmul.mubr.msk.bf16.vlgmr.msra.gmra.mrb[36].mxu1 %vm247_vm4, %v940_v22  ;;  %2661 = vmatmul.mubr.msk.bf16.vlgmr.msra.gmra.mrb[24].mxu0 %vm247_vm4, %v940_v22 }
0x1114   :  { %2671 = vmatpush3.bf16.msra.mxu0 %v3073_v7  ;;  %2672 = vmatprep.mubr.msk.bf16.mxu0 %vm2997_vm2, %v2996_v5 }
0x1115   :  { %2666 = vmatprep.mubr.msk.bf16.mxu1 %vm2997_vm2, %v2996_v5  ;;  %2682 = vmatprep.subr.bf16.mxu0 %v2996_v5 }
0x1116   :  { %2665 = vmatpush3.bf16.msra.mxu1 %v2865_v45 }
0x1117   :  { %2676 = vmatprep.subr.bf16.mxu1 %v2996_v5 }
0x11e6   :  { %v984_v23 = vpop.f32.mrb[36].mxu1  ;;  %v1026_v25 = vpop.f32.mrb[24].mxu0 }
0x11e7   :  { %v990_v26 = vadd.f32 %v984_v23, %v866_v60  ;;  %v1032_v27 = vadd.f32 %v1026_v25, %v991_v24  ;;  %v2656_v28 = vpop.f32.mrb[37].mxu1  ;;  %v2662_v29 = vpop.f32.mrb[25].mxu0 }
0x11e8   :  { %v987_v30 = vpop.f32.mrb[38].mxu1  ;;  %v1029_v31 = vpop.f32.mrb[26].mxu0 }
0x11e9   :  { %v2407_v32 = vmul.f32 -1.442695, %v1032_v27  ;;  %v2657_v33 = vpop.f32.mrb[39].mxu1  ;;  %v2663_v34 = vpop.f32.mrb[27].mxu0 }
0x11eb   :  { %2911 = vpow2.f32 %v2407_v32 }
0x11f5   :  { %v2912_v35 = vpop.eup %2911 }
0x11f6   :  { %v1036_v36 = vadd.f32 1.0, %v2912_v35 }
0x11f8   :  { %2913 = vrcp.f32 %v1036_v36 }
0x1202   :  { %v2914_v37 = vpop.eup %2913 }
0x1203   :  { %v1039_v38 = vmul.f32 2.0, %v2914_v37  ;;  %v1041_v42 = vmul.f32 %v2914_v37, %v927_v17 }
0x1205   :  { %v2408_v39 = vadd.f32 -1.0, %v1039_v38 }
0x1207   :  { %1043 = vrot.lane.b32.xlu0 %v2408_v39, %s2999_s3  ;;  %v2867_v39 = vld [vmem:[%s3469_s4 + $0x40] sm:$0xff]  }
0x1279   :  { %v1044_v40 = vpop.permute.xlu0 %1043 }
0x127a   :  { %v1046_v41 = vmul.f32 %v2914_v37, %v1044_v40 }
0x127c   :  { %1048 = vrot.lane.b32.xlu1 %v1046_v41, %s3000_s18 }
0x12ee   :  { %v1049_v43 = vpop.permute.xlu1 %1048 }
0x12ef   :  { %v1051_v44 = vadd.f32 %v1049_v43, %v1041_v42 }
0x12f1   :  { %2915 = vtanh.f32 %v1051_v44 }
0x12fb   :  { %v2916_v46 = vpop.eup %2915 }
0x12fc   :  { %1054 = vrot.lane.b32.xlu0 %v2916_v46, %s3001_s19  ;;  %v1363_v46 = vld [vmem:[#allocation2 + $0x48] sm:$0xff] }
0x136e   :  { %v1055_v47 = vpop.permute.xlu0 %1054 }
0x136f   :  { %v1057_v48 = vmul.f32 %v2914_v37, %v1055_v47 }
0x1371   :  { %v1058_v49 = vpack.c.bf16 %v1057_v48, %v1057_v48 }
0x1373   :  { %1063 = vrot.lane.b32.xlu1 %v1058_v49, %s3002_s20 }
0x13e5   :  { %v1064_v50 = vpop.permute.xlu1 %1063 }
0x13e6   :  { %2667 = vmatmul.mubr.msk.bf16.vlgmr.msra.gmra.mrb[40].mxu1 %vm247_vm4, %v1064_v50  ;;  %2673 = vmatmul.mubr.msk.bf16.vlgmr.msra.gmra.mrb[28].mxu0 %vm247_vm4, %v1064_v50 }
0x13e7   :  { %2683 = vmatpush3.bf16.msra.mxu0 %v3073_v7  ;;  %2684 = vmatprep.mubr.msk.bf16.mxu0 %vm2997_vm2, %v2996_v5 }
0x13e8   :  { %2678 = vmatprep.mubr.msk.bf16.mxu1 %vm2997_vm2, %v2996_v5  ;;  %2694 = vmatprep.subr.bf16.mxu0 %v2996_v5 }
0x13e9   :  { %2677 = vmatpush3.bf16.msra.mxu1 %v2866_v11 }
0x13ea   :  { %2688 = vmatprep.subr.bf16.mxu1 %v2996_v5 }
0x14b9   :  { %v1108_v51 = vpop.f32.mrb[40].mxu1  ;;  %v1150_v53 = vpop.f32.mrb[28].mxu0 }
0x14ba   :  { %v1114_v54 = vadd.f32 %v1108_v51, %v990_v26  ;;  %v1156_v55 = vadd.f32 %v1150_v53, %v1115_v52  ;;  %v2668_v56 = vpop.f32.mrb[41].mxu1  ;;  %v2674_v57 = vpop.f32.mrb[29].mxu0 }
0x14bb   :  { %v1111_v58 = vpop.f32.mrb[42].mxu1  ;;  %v1153_v59 = vpop.f32.mrb[30].mxu0 }
0x14bc   :  { %v2414_v60 = vmul.f32 -1.442695, %v1156_v55  ;;  %v2669_v61 = vpop.f32.mrb[43].mxu1  ;;  %v2675_v62 = vpop.f32.mrb[31].mxu0 }
0x14be   :  { %2917 = vpow2.f32 %v2414_v60 }
0x14c8   :  { %v2918_v9 = vpop.eup %2917 }
0x14c9   :  { %v1160_v63 = vadd.f32 1.0, %v2918_v9 }
0x14cb   :  { %2919 = vrcp.f32 %v1160_v63 }
0x14d5   :  { %v2920_v0 = vpop.eup %2919 }
0x14d6   :  { %v1163_v1 = vmul.f32 2.0, %v2920_v0  ;;  %v1165_v6 = vmul.f32 %v2920_v0, %v1051_v44 }
0x14d8   :  { %v2415_v2 = vadd.f32 -1.0, %v1163_v1  ;;  %v2868_v1 = vld [vmem:[%s3469_s4 + $0x48] sm:$0xff]  }
0x14da   :  { %1167 = vrot.lane.b32.xlu0 %v2415_v2, %s2999_s3 }
0x154c   :  { %v1168_v3 = vpop.permute.xlu0 %1167 }
0x154d   :  { %v1170_v4 = vmul.f32 %v2920_v0, %v1168_v3 }
0x154f   :  { %1172 = vrot.lane.b32.xlu1 %v1170_v4, %s3000_s18 }
0x15c1   :  { %v1173_v8 = vpop.permute.xlu1 %1172 }
0x15c2   :  { %v1175_v10 = vadd.f32 %v1173_v8, %v1165_v6 }
0x15c4   :  { %2921 = vtanh.f32 %v1175_v10 }
0x15ce   :  { %v2922_v12 = vpop.eup %2921 }
0x15cf   :  { %1178 = vrot.lane.b32.xlu0 %v2922_v12, %s3001_s19  ;;  %v1487_v12 = vld [vmem:[#allocation2 + $0x50] sm:$0xff] }
0x1641   :  { %v1179_v13 = vpop.permute.xlu0 %1178 }
0x1642   :  { %v1181_v14 = vmul.f32 %v2920_v0, %v1179_v13 }
0x1644   :  { %v1182_v15 = vpack.c.bf16 %v1181_v14, %v1181_v14 }
0x1646   :  { %1187 = vrot.lane.b32.xlu1 %v1182_v15, %s3002_s20 }
0x16b8   :  { %v1188_v17 = vpop.permute.xlu1 %1187 }
0x16b9   :  { %2679 = vmatmul.mubr.msk.bf16.vlgmr.msra.gmra.mrb[44].mxu1 %vm247_vm4, %v1188_v17  ;;  %2685 = vmatmul.mubr.msk.bf16.vlgmr.msra.gmra.mrb[32].mxu0 %vm247_vm4, %v1188_v17 }
0x16ba   :  { %2695 = vmatpush3.bf16.msra.mxu0 %v3073_v7  ;;  %2696 = vmatprep.mubr.msk.bf16.mxu0 %vm2997_vm2, %v2996_v5 }
0x16bb   :  { %2690 = vmatprep.mubr.msk.bf16.mxu1 %vm2997_vm2, %v2996_v5  ;;  %2706 = vmatprep.subr.bf16.mxu0 %v2996_v5 }
0x16bc   :  { %2689 = vmatpush3.bf16.msra.mxu1 %v2867_v39 }
0x16bd   :  { %2700 = vmatprep.subr.bf16.mxu1 %v2996_v5 }
0x178c   :  { %v1232_v18 = vpop.f32.mrb[44].mxu1  ;;  %v1274_v20 = vpop.f32.mrb[32].mxu0 }
0x178d   :  { %v1238_v16 = vadd.f32 %v1232_v18, %v1114_v54  ;;  %v1280_v21 = vadd.f32 %v1274_v20, %v1239_v19  ;;  %v2680_v22 = vpop.f32.mrb[45].mxu1  ;;  %v2686_v23 = vpop.f32.mrb[33].mxu0 }
0x178e   :  { %v1235_v24 = vpop.f32.mrb[46].mxu1  ;;  %v1277_v25 = vpop.f32.mrb[34].mxu0 }
0x178f   :  { %v2421_v26 = vmul.f32 -1.442695, %v1280_v21  ;;  %v2681_v27 = vpop.f32.mrb[47].mxu1  ;;  %v2687_v28 = vpop.f32.mrb[35].mxu0 }
0x1791   :  { %2923 = vpow2.f32 %v2421_v26 }
0x179b   :  { %v2924_v29 = vpop.eup %2923 }
0x179c   :  { %v1284_v30 = vadd.f32 1.0, %v2924_v29 }
0x179e   :  { %2925 = vrcp.f32 %v1284_v30 }
0x17a8   :  { %v2926_v31 = vpop.eup %2925 }
0x17a9   :  { %v1287_v32 = vmul.f32 2.0, %v2926_v31  ;;  %v1289_v36 = vmul.f32 %v2926_v31, %v1175_v10  ;;  %v3303_v10 = vld [vmem:[%s3467_s2] sm:$0xff]  }
0x17ab   :  { %v2422_v33 = vadd.f32 -1.0, %v1287_v32 }
0x17ad   :  { %1291 = vrot.lane.b32.xlu0 %v2422_v33, %s2999_s3  ;;  %v2869_v33 = vld [vmem:[%s3469_s4 + $0x50] sm:$0xff]  }
0x181f   :  { %v1292_v34 = vpop.permute.xlu0 %1291 }
0x1820   :  { %v1294_v35 = vmul.f32 %v2926_v31, %v1292_v34 }
0x1822   :  { %1296 = vrot.lane.b32.xlu1 %v1294_v35, %s3000_s18 }
0x1894   :  { %v1297_v37 = vpop.permute.xlu1 %1296 }
0x1895   :  { %v1299_v38 = vadd.f32 %v1297_v37, %v1289_v36 }
0x1897   :  { %2927 = vtanh.f32 %v1299_v38 }
0x18a1   :  { %v2928_v40 = vpop.eup %2927 }
0x18a2   :  { %1302 = vrot.lane.b32.xlu0 %v2928_v40, %s3001_s19  ;;  %v1611_v40 = vld [vmem:[#allocation2 + $0x58] sm:$0xff] }
0x1914   :  { %v1303_v41 = vpop.permute.xlu0 %1302 }
0x1915   :  { %v1305_v42 = vmul.f32 %v2926_v31, %v1303_v41 }
0x1917   :  { %v1306_v43 = vpack.c.bf16 %v1305_v42, %v1305_v42 }
0x1919   :  { %1311 = vrot.lane.b32.xlu1 %v1306_v43, %s3002_s20 }
0x198b   :  { %v1312_v44 = vpop.permute.xlu1 %1311 }
0x198c   :  { %2691 = vmatmul.mubr.msk.bf16.vlgmr.msra.gmra.mrb[48].mxu1 %vm247_vm4, %v1312_v44  ;;  %2697 = vmatmul.mubr.msk.bf16.vlgmr.msra.gmra.mrb[36].mxu0 %vm247_vm4, %v1312_v44 }
0x198d   :  { %2707 = vmatpush3.bf16.msra.mxu0 %v3073_v7  ;;  %2708 = vmatprep.mubr.msk.bf16.mxu0 %vm2997_vm2, %v2996_v5 }
0x198e   :  { %2702 = vmatprep.mubr.msk.bf16.mxu1 %vm2997_vm2, %v2996_v5  ;;  %2718 = vmatprep.subr.bf16.mxu0 %v2996_v5 }
0x198f   :  { %2701 = vmatpush3.bf16.msra.mxu1 %v2868_v1 }
0x1990   :  { %2712 = vmatprep.subr.bf16.mxu1 %v2996_v5 }
0x1a5f   :  { %v1356_v45 = vpop.f32.mrb[48].mxu1  ;;  %v1398_v47 = vpop.f32.mrb[36].mxu0 }
0x1a60   :  { %v1362_v48 = vadd.f32 %v1356_v45, %v1238_v16  ;;  %v1404_v49 = vadd.f32 %v1398_v47, %v1363_v46  ;;  %v2692_v50 = vpop.f32.mrb[49].mxu1  ;;  %v2698_v51 = vpop.f32.mrb[37].mxu0 }
0x1a61   :  { %v1359_v52 = vpop.f32.mrb[50].mxu1  ;;  %v1401_v53 = vpop.f32.mrb[38].mxu0 }
0x1a62   :  { %v2428_v54 = vmul.f32 -1.442695, %v1404_v49  ;;  %v2693_v55 = vpop.f32.mrb[51].mxu1  ;;  %v2699_v7 = vpop.f32.mrb[39].mxu0 }
0x1a64   :  { %2929 = vpow2.f32 %v2428_v54 }
0x1a6e   :  { %v2930_v56 = vpop.eup %2929 }
0x1a6f   :  { %v1408_v57 = vadd.f32 1.0, %v2930_v56 }
0x1a71   :  { %2931 = vrcp.f32 %v1408_v57 }
0x1a7b   :  { %v2932_v58 = vpop.eup %2931 }
0x1a7c   :  { %v1411_v59 = vmul.f32 2.0, %v2932_v58  ;;  %v1413_v9 = vmul.f32 %v2932_v58, %v1299_v38 }
0x1a7e   :  { %v2429_v60 = vadd.f32 -1.0, %v1411_v59 }
0x1a80   :  { %1415 = vrot.lane.b32.xlu0 %v2429_v60, %s2999_s3  ;;  %v2870_v60 = vld [vmem:[%s3469_s4 + $0x58] sm:$0xff]  }
0x1af2   :  { %v1416_v61 = vpop.permute.xlu0 %1415 }
0x1af3   :  { %v1418_v62 = vmul.f32 %v2932_v58, %v1416_v61 }
0x1af5   :  { %1420 = vrot.lane.b32.xlu1 %v1418_v62, %s3000_s18 }
0x1b67   :  { %v1421_v63 = vpop.permute.xlu1 %1420 }
0x1b68   :  { %v1423_v0 = vadd.f32 %v1421_v63, %v1413_v9 }
0x1b6a   :  { %2933 = vtanh.f32 %v1423_v0 }
0x1b74   :  { %v2934_v2 = vpop.eup %2933 }
0x1b75   :  { %1426 = vrot.lane.b32.xlu0 %v2934_v2, %s3001_s19  ;;  %v1735_v2 = vld [vmem:[#allocation2 + $0x60] sm:$0xff] }
0x1be7   :  { %v1427_v3 = vpop.permute.xlu0 %1426 }
0x1be8   :  { %v1429_v4 = vmul.f32 %v2932_v58, %v1427_v3 }
0x1bea   :  { %v1430_v6 = vpack.c.bf16 %v1429_v4, %v1429_v4 }
0x1bec   :  { %1435 = vrot.lane.b32.xlu1 %v1430_v6, %s3002_s20 }
0x1c5e   :  { %v1436_v8 = vpop.permute.xlu1 %1435 }
0x1c5f   :  { %2703 = vmatmul.mubr.msk.bf16.vlgmr.msra.gmra.mrb[52].mxu1 %vm247_vm4, %v1436_v8  ;;  %2709 = vmatmul.mubr.msk.bf16.vlgmr.msra.gmra.mrb[40].mxu0 %vm247_vm4, %v1436_v8 }
0x1c60   :  { %2719 = vmatpush3.bf16.msra.mxu0 %v3303_v10  ;;  %2720 = vmatprep.mubr.msk.bf16.mxu0 %vm2997_vm2, %v2996_v5 }
0x1c61   :  { %2714 = vmatprep.mubr.msk.bf16.mxu1 %vm2997_vm2, %v2996_v5  ;;  %2730 = vmatprep.subr.bf16.mxu0 %v2996_v5 }
0x1c62   :  { %2713 = vmatpush3.bf16.msra.mxu1 %v2869_v33 }
0x1c63   :  { %2724 = vmatprep.subr.bf16.mxu1 %v2996_v5 }
0x1d32   :  { %v1480_v11 = vpop.f32.mrb[52].mxu1  ;;  %v1522_v13 = vpop.f32.mrb[40].mxu0 }
0x1d33   :  { %v1486_v14 = vadd.f32 %v1480_v11, %v1362_v48  ;;  %v1528_v15 = vadd.f32 %v1522_v13, %v1487_v12  ;;  %v2704_v17 = vpop.f32.mrb[53].mxu1  ;;  %v2710_v18 = vpop.f32.mrb[41].mxu0 }
0x1d34   :  { %v1483_v19 = vpop.f32.mrb[54].mxu1  ;;  %v1525_v20 = vpop.f32.mrb[42].mxu0 }
0x1d35   :  { %v2435_v16 = vmul.f32 -1.442695, %v1528_v15  ;;  %v2705_v21 = vpop.f32.mrb[55].mxu1  ;;  %v2711_v22 = vpop.f32.mrb[43].mxu0 }
0x1d37   :  { %2935 = vpow2.f32 %v2435_v16 }
0x1d41   :  { %v2936_v23 = vpop.eup %2935 }
0x1d42   :  { %v1532_v24 = vadd.f32 1.0, %v2936_v23 }
0x1d44   :  { %2937 = vrcp.f32 %v1532_v24 }
0x1d4e   :  { %v2938_v25 = vpop.eup %2937 }
0x1d4f   :  { %v1535_v26 = vmul.f32 2.0, %v2938_v25  ;;  %v1537_v30 = vmul.f32 %v2938_v25, %v1423_v0 }
0x1d51   :  { %v2436_v27 = vadd.f32 -1.0, %v1535_v26 }
0x1d53   :  { %1539 = vrot.lane.b32.xlu0 %v2436_v27, %s2999_s3  ;;  %v2871_v27 = vld [vmem:[%s3469_s4 + $0x60] sm:$0xff]  }
0x1dc5   :  { %v1540_v28 = vpop.permute.xlu0 %1539 }
0x1dc6   :  { %v1542_v29 = vmul.f32 %v2938_v25, %v1540_v28 }
0x1dc8   :  { %1544 = vrot.lane.b32.xlu1 %v1542_v29, %s3000_s18 }
0x1e3a   :  { %v1545_v31 = vpop.permute.xlu1 %1544 }
0x1e3b   :  { %v1547_v32 = vadd.f32 %v1545_v31, %v1537_v30 }
0x1e3d   :  { %2939 = vtanh.f32 %v1547_v32 }
0x1e47   :  { %v2940_v34 = vpop.eup %2939 }
0x1e48   :  { %1550 = vrot.lane.b32.xlu0 %v2940_v34, %s3001_s19  ;;  %v1859_v34 = vld [vmem:[#allocation2 + $0x68] sm:$0xff] }
0x1eba   :  { %v1551_v35 = vpop.permute.xlu0 %1550 }
0x1ebb   :  { %v1553_v36 = vmul.f32 %v2938_v25, %v1551_v35 }
0x1ebd   :  { %v1554_v37 = vpack.c.bf16 %v1553_v36, %v1553_v36 }
0x1ebf   :  { %1559 = vrot.lane.b32.xlu1 %v1554_v37, %s3002_s20 }
0x1f31   :  { %v1560_v38 = vpop.permute.xlu1 %1559 }
0x1f32   :  { %2715 = vmatmul.mubr.msk.bf16.vlgmr.msra.gmra.mrb[56].mxu1 %vm247_vm4, %v1560_v38  ;;  %2721 = vmatmul.mubr.msk.bf16.vlgmr.msra.gmra.mrb[44].mxu0 %vm247_vm4, %v1560_v38 }
0x1f33   :  { %2731 = vmatpush3.bf16.msra.mxu0 %v3303_v10  ;;  %2732 = vmatprep.mubr.msk.bf16.mxu0 %vm2997_vm2, %v2996_v5 }
0x1f34   :  { %2726 = vmatprep.mubr.msk.bf16.mxu1 %vm2997_vm2, %v2996_v5  ;;  %2742 = vmatprep.subr.bf16.mxu0 %v2996_v5 }
0x1f35   :  { %2725 = vmatpush3.bf16.msra.mxu1 %v2870_v60 }
0x1f36   :  { %2736 = vmatprep.subr.bf16.mxu1 %v2996_v5 }
0x2005   :  { %v1604_v39 = vpop.f32.mrb[56].mxu1  ;;  %v1646_v41 = vpop.f32.mrb[44].mxu0 }
0x2006   :  { %v1610_v42 = vadd.f32 %v1604_v39, %v1486_v14  ;;  %v1652_v43 = vadd.f32 %v1646_v41, %v1611_v40  ;;  %v2716_v44 = vpop.f32.mrb[57].mxu1  ;;  %v2722_v45 = vpop.f32.mrb[45].mxu0 }
0x2007   :  { %v1607_v46 = vpop.f32.mrb[58].mxu1  ;;  %v1649_v47 = vpop.f32.mrb[46].mxu0 }
0x2008   :  { %v2442_v48 = vmul.f32 -1.442695, %v1652_v43  ;;  %v2717_v49 = vpop.f32.mrb[59].mxu1  ;;  %v2723_v50 = vpop.f32.mrb[47].mxu0 }
0x200a   :  { %2941 = vpow2.f32 %v2442_v48 }
0x2014   :  { %v2942_v51 = vpop.eup %2941 }
0x2015   :  { %v1656_v52 = vadd.f32 1.0, %v2942_v51 }
0x2017   :  { %2943 = vrcp.f32 %v1656_v52 }
0x2021   :  { %v2944_v53 = vpop.eup %2943 }
0x2022   :  { %v1659_v54 = vmul.f32 2.0, %v2944_v53  ;;  %v1661_v57 = vmul.f32 %v2944_v53, %v1547_v32 }
0x2024   :  { %v2443_v55 = vadd.f32 -1.0, %v1659_v54 }
0x2026   :  { %1663 = vrot.lane.b32.xlu0 %v2443_v55, %s2999_s3  ;;  %v2872_v55 = vld [vmem:[%s3469_s4 + $0x68] sm:$0xff]  }
0x2098   :  { %v1664_v7 = vpop.permute.xlu0 %1663 }
0x2099   :  { %v1666_v56 = vmul.f32 %v2944_v53, %v1664_v7 }
0x209b   :  { %1668 = vrot.lane.b32.xlu1 %v1666_v56, %s3000_s18 }
0x210d   :  { %v1669_v58 = vpop.permute.xlu1 %1668 }
0x210e   :  { %v1671_v59 = vadd.f32 %v1669_v58, %v1661_v57 }
0x2110   :  { %2945 = vtanh.f32 %v1671_v59 }
0x211a   :  { %v2946_v61 = vpop.eup %2945 }
0x211b   :  { %1674 = vrot.lane.b32.xlu0 %v2946_v61, %s3001_s19  ;;  %v1983_v61 = vld [vmem:[#allocation2 + $0x70] sm:$0xff] }
0x218d   :  { %v1675_v62 = vpop.permute.xlu0 %1674 }
0x218e   :  { %v1677_v9 = vmul.f32 %v2944_v53, %v1675_v62 }
0x2190   :  { %v1678_v63 = vpack.c.bf16 %v1677_v9, %v1677_v9 }
0x2192   :  { %1683 = vrot.lane.b32.xlu1 %v1678_v63, %s3002_s20 }
0x2204   :  { %v1684_v0 = vpop.permute.xlu1 %1683 }
0x2205   :  { %2727 = vmatmul.mubr.msk.bf16.vlgmr.msra.gmra.mrb[60].mxu1 %vm247_vm4, %v1684_v0  ;;  %2733 = vmatmul.mubr.msk.bf16.vlgmr.msra.gmra.mrb[48].mxu0 %vm247_vm4, %v1684_v0 }
0x2206   :  { %2743 = vmatpush3.bf16.msra.mxu0 %v3303_v10  ;;  %2744 = vmatprep.mubr.msk.bf16.mxu0 %vm2997_vm2, %v2996_v5 }
0x2207   :  { %2738 = vmatprep.mubr.msk.bf16.mxu1 %vm2997_vm2, %v2996_v5  ;;  %2754 = vmatprep.subr.bf16.mxu0 %v2996_v5 }
0x2208   :  { %2737 = vmatpush3.bf16.msra.mxu1 %v2871_v27  ;;  %v2107_v27 = vld [vmem:[#allocation2 + $0x78] sm:$0xff] }
0x2209   :  { %2748 = vmatprep.subr.bf16.mxu1 %v2996_v5 }
0x22d8   :  { %v1728_v1 = vpop.f32.mrb[60].mxu1  ;;  %v1770_v3 = vpop.f32.mrb[48].mxu0 }
0x22d9   :  { %v1734_v4 = vadd.f32 %v1728_v1, %v1610_v42  ;;  %v1776_v6 = vadd.f32 %v1770_v3, %v1735_v2  ;;  %v2728_v8 = vpop.f32.mrb[61].mxu1  ;;  %v2734_v11 = vpop.f32.mrb[49].mxu0 }
0x22da   :  { %v1731_v12 = vpop.f32.mrb[62].mxu1  ;;  %v1773_v13 = vpop.f32.mrb[50].mxu0 }
0x22db   :  { %v2449_v14 = vmul.f32 -1.442695, %v1776_v6  ;;  %v2729_v15 = vpop.f32.mrb[63].mxu1  ;;  %v2735_v17 = vpop.f32.mrb[51].mxu0 }
0x22dd   :  { %2947 = vpow2.f32 %v2449_v14 }
0x22e7   :  { %v2948_v18 = vpop.eup %2947 }
0x22e8   :  { %v1780_v19 = vadd.f32 1.0, %v2948_v18 }
0x22ea   :  { %2949 = vrcp.f32 %v1780_v19 }
0x22f4   :  { %v2950_v20 = vpop.eup %2949 }
0x22f5   :  { %v1783_v16 = vmul.f32 2.0, %v2950_v20  ;;  %v1785_v24 = vmul.f32 %v2950_v20, %v1671_v59 }
0x22f7   :  { %v2450_v21 = vadd.f32 -1.0, %v1783_v16  ;;  %v2873_v16 = vld [vmem:[%s3469_s4 + $0x70] sm:$0xff]  }
0x22f9   :  { %1787 = vrot.lane.b32.xlu0 %v2450_v21, %s2999_s3 }
0x236b   :  { %v1788_v22 = vpop.permute.xlu0 %1787 }
0x236c   :  { %v1790_v23 = vmul.f32 %v2950_v20, %v1788_v22 }
0x236e   :  { %1792 = vrot.lane.b32.xlu1 %v1790_v23, %s3000_s18 }
0x23e0   :  { %v1793_v25 = vpop.permute.xlu1 %1792 }
0x23e1   :  { %v1795_v26 = vadd.f32 %v1793_v25, %v1785_v24 }
0x23e3   :  { %2951 = vtanh.f32 %v1795_v26 }
0x23ed   :  { %v2952_v28 = vpop.eup %2951 }
0x23ee   :  { %1798 = vrot.lane.b32.xlu0 %v2952_v28, %s3001_s19 }
0x2460   :  { %v1799_v29 = vpop.permute.xlu0 %1798 }
0x2461   :  { %v1801_v30 = vmul.f32 %v2950_v20, %v1799_v29 }
0x2463   :  { %v1802_v31 = vpack.c.bf16 %v1801_v30, %v1801_v30 }
0x2465   :  { %1807 = vrot.lane.b32.xlu1 %v1802_v31, %s3002_s20 }
0x24d7   :  { %v1808_v32 = vpop.permute.xlu1 %1807 }
0x24d8   :  { %2739 = vmatmul.mubr.msk.bf16.vlgmr.msra.gmra.mrb[64].mxu1 %vm247_vm4, %v1808_v32  ;;  %2745 = vmatmul.mubr.msk.bf16.vlgmr.msra.gmra.mrb[52].mxu0 %vm247_vm4, %v1808_v32 }
0x24d9   :  { %2755 = vmatpush3.bf16.msra.mxu0 %v3303_v10  ;;  %2756 = vmatprep.mubr.msk.bf16.mxu0 %vm2997_vm2, %v2996_v5 }
0x24da   :  { %2750 = vmatprep.mubr.msk.bf16.mxu1 %vm2997_vm2, %v2996_v5  ;;  %2766 = vmatprep.subr.bf16.mxu0 %v2996_v5 }
0x24db   :  { %2749 = vmatpush3.bf16.msra.mxu1 %v2872_v55 }
0x24dc   :  { %2760 = vmatprep.subr.bf16.mxu1 %v2996_v5 }
0x25ab   :  { %v1852_v33 = vpop.f32.mrb[64].mxu1  ;;  %v1894_v35 = vpop.f32.mrb[52].mxu0 }
0x25ac   :  { %v1858_v36 = vadd.f32 %v1852_v33, %v1734_v4  ;;  %v1900_v37 = vadd.f32 %v1894_v35, %v1859_v34  ;;  %v2740_v38 = vpop.f32.mrb[65].mxu1  ;;  %v2746_v39 = vpop.f32.mrb[53].mxu0 }
0x25ad   :  { %v1855_v40 = vpop.f32.mrb[66].mxu1  ;;  %v1897_v41 = vpop.f32.mrb[54].mxu0 }
0x25ae   :  { %v2456_v42 = vmul.f32 -1.442695, %v1900_v37  ;;  %v2741_v43 = vpop.f32.mrb[67].mxu1  ;;  %v2747_v44 = vpop.f32.mrb[55].mxu0 }
0x25b0   :  { %2953 = vpow2.f32 %v2456_v42 }
0x25ba   :  { %v2954_v45 = vpop.eup %2953 }
0x25bb   :  { %v1904_v46 = vadd.f32 1.0, %v2954_v45 }
0x25bd   :  { %2955 = vrcp.f32 %v1904_v46 }
0x25c7   :  { %v2956_v47 = vpop.eup %2955 }
0x25c8   :  { %v1907_v48 = vmul.f32 2.0, %v2956_v47  ;;  %v1909_v52 = vmul.f32 %v2956_v47, %v1795_v26 }
0x25ca   :  { %v2457_v49 = vadd.f32 -1.0, %v1907_v48 }
0x25cc   :  { %1911 = vrot.lane.b32.xlu0 %v2457_v49, %s2999_s3  ;;  %v2240_v49 = vld [vmem:[%s3471_s6] sm:$0xff] }
0x263e   :  { %v1912_v50 = vpop.permute.xlu0 %1911 }
0x263f   :  { %v1914_v51 = vmul.f32 %v2956_v47, %v1912_v50  ;;  %v2241_v50 = vld [vmem:[%s3471_s6 + $0x8] sm:$0xff] }
0x2641   :  { %1916 = vrot.lane.b32.xlu1 %v1914_v51, %s3000_s18  ;;  %v2242_v51 = vld [vmem:[%s3471_s6 + $0x10] sm:$0xff] }
0x26b3   :  { %v1917_v53 = vpop.permute.xlu1 %1916 }
0x26b4   :  { %v1919_v54 = vadd.f32 %v1917_v53, %v1909_v52  ;;  %v3003_v52 = vmov 0.0|0.0   ;;  %v2814_v53 = vpack.c.bf16 %v2241_v50, %v2240_v49 }
0x26b6   :  { %2957 = vtanh.f32 %v1919_v54 }
0x26c0   :  { %v2958_v7 = vpop.eup %2957 }
0x26c1   :  { %1922 = vrot.lane.b32.xlu0 %v2958_v7, %s3001_s19  ;;  %v2244_v7 = vld [vmem:[%s3471_s6 + $0x20] sm:$0xff] }
0x2733   :  { %v1923_v56 = vpop.permute.xlu0 %1922 }
0x2734   :  { %v1925_v57 = vmul.f32 %v2956_v47, %v1923_v56  ;;  %v2874_v47 = vld [vmem:[%s3469_s4 + $0x78] sm:$0xff]   ;;  %v2245_v56 = vld [vmem:[%s3471_s6 + $0x28] sm:$0xff] }
0x2736   :  { %v1926_v58 = vpack.c.bf16 %v1925_v57, %v1925_v57  ;;  %v2820_v57 = vpack.c.bf16 %v2245_v56, %v2244_v7 }
0x2738   :  { %1931 = vrot.lane.b32.xlu1 %v1926_v58, %s3002_s20 }
0x27aa   :  { %v1932_v59 = vpop.permute.xlu1 %1931 }
0x27ab   :  { %2751 = vmatmul.mubr.msk.bf16.vlgmr.msra.gmra.mrb[68].mxu1 %vm247_vm4, %v1932_v59  ;;  %2757 = vmatmul.mubr.msk.bf16.vlgmr.msra.gmra.mrb[56].mxu0 %vm247_vm4, %v1932_v59  ;;  %v2246_v59 = vld [vmem:[%s3471_s6 + $0x30] sm:$0xff] }
0x27ac   :  { %2767 = vmatpush3.bf16.msra.mxu0 %v3303_v10  ;;  %2768 = vmatprep.mubr.msk.bf16.mxu0 %vm2997_vm2, %v2996_v5 }
0x27ad   :  { %2762 = vmatprep.mubr.msk.bf16.mxu1 %vm2997_vm2, %v2996_v5  ;;  %2761 = vmatpush3.bf16.msra.mxu1 %v2873_v16 }
0x27ae   :  { %2772 = vmatprep.subr.bf16.mxu1 %v2996_v5  ;;  %2813 = vmatprep.subr.bf16.mxu0 %v3003_v52 }
0x287e   :  { %v1976_v60 = vpop.f32.mrb[68].mxu1  ;;  %v2018_v62 = vpop.f32.mrb[56].mxu0 }
0x287f   :  { %v1982_v9 = vadd.f32 %v1976_v60, %v1858_v36  ;;  %v2024_v63 = vadd.f32 %v2018_v62, %v1983_v61  ;;  %v2752_v0 = vpop.f32.mrb[69].mxu1  ;;  %v2758_v1 = vpop.f32.mrb[57].mxu0  ;;  %v2247_v60 = vld [vmem:[%s3471_s6 + $0x38] sm:$0xff] }
0x2880   :  { %v1979_v2 = vpop.f32.mrb[70].mxu1  ;;  %v2021_v3 = vpop.f32.mrb[58].mxu0  ;;  %v2249_v0 = vld [vmem:[%s3471_s6 + $0x48] sm:$0xff] }
0x2881   :  { %v2463_v4 = vmul.f32 -1.442695, %v2024_v63  ;;  %v2753_v6 = vpop.f32.mrb[71].mxu1  ;;  %v2759_v8 = vpop.f32.mrb[59].mxu0  ;;  %v2248_v63 = vld [vmem:[%s3471_s6 + $0x40] sm:$0xff]  ;;  %v2250_v2 = vld [vmem:[%s3471_s6 + $0x50] sm:$0xff] }
0x2882   :  { %v2826_v1 = vpack.c.bf16 %v2249_v0, %v2248_v63  ;;  %v2251_v3 = vld [vmem:[%s3471_s6 + $0x58] sm:$0xff]  ;;  %v2252_v8 = vld [vmem:[%s3471_s6 + $0x60] sm:$0xff] }
0x2883   :  { %2959 = vpow2.f32 %v2463_v4  ;;  %v2829_v4 = vpack.c.bf16 %v2251_v3, %v2250_v2 }
0x288d   :  { %v2960_v10 = vpop.eup %2959 }
0x288e   :  { %v2028_v11 = vadd.f32 1.0, %v2960_v10  ;;  %v2253_v10 = vld [vmem:[%s3471_s6 + $0x68] sm:$0xff] }
0x2890   :  { %2961 = vrcp.f32 %v2028_v11  ;;  %v2832_v11 = vpack.c.bf16 %v2253_v10, %v2252_v8 }
0x289a   :  { %v2962_v12 = vpop.eup %2961 }
0x289b   :  { %v2031_v13 = vmul.f32 2.0, %v2962_v12  ;;  %v2033_v18 = vmul.f32 %v2962_v12, %v1919_v54  ;;  %v2243_v54 = vld [vmem:[%s3471_s6 + $0x18] sm:$0xff] }
0x289c   :  { %v2817_v55 = vpack.c.bf16 %v2243_v54, %v2242_v51 }
0x289d   :  { %v2464_v14 = vadd.f32 -1.0, %v2031_v13  ;;  %v2255_v13 = vld [vmem:[%s3471_s6 + $0x78] sm:$0xff] }
0x289f   :  { %2035 = vrot.lane.b32.xlu0 %v2464_v14, %s2999_s3 }
0x2911   :  { %v2036_v15 = vpop.permute.xlu0 %2035 }
0x2912   :  { %v2038_v17 = vmul.f32 %v2962_v12, %v2036_v15 }
0x2914   :  { %2040 = vrot.lane.b32.xlu1 %v2038_v17, %s3000_s18  ;;  %v2476_v17 = vld [vmem:[%s3470_s5] ss:$0 sm:$0xff] }
0x2986   :  { %v2041_v19 = vpop.permute.xlu1 %2040 }
0x2987   :  { %v2043_v20 = vadd.f32 %v2041_v19, %v2033_v18 }
0x2989   :  { %2963 = vtanh.f32 %v2043_v20 }
0x2993   :  { %v2964_v21 = vpop.eup %2963 }
0x2994   :  { %2046 = vrot.lane.b32.xlu0 %v2964_v21, %s3001_s19 }
0x2a06   :  { %v2047_v22 = vpop.permute.xlu0 %2046 }
0x2a07   :  { %v2049_v23 = vmul.f32 %v2962_v12, %v2047_v22  ;;  %v2254_v12 = vld [vmem:[%s3471_s6 + $0x70] sm:$0xff]  ;;  %s3004_s6 = smov [#allocation3]  }
0x2a08   :  { %v2835_v14 = vpack.c.bf16 %v2255_v13, %v2254_v12  ;;  %s2341_s25 = sshll.u32 %s3004_s6, 4  ;;  %s2342_s25 = int_to_ptr.vmem [resolvable:$true] %s2341_s25 }
0x2a09   :  { %v2050_v24 = vpack.c.bf16 %v2049_v23, %v2049_v23  ;;  %v2477_v23 = vld [vmem:[%s3472_s7] ss:$0 sm:$0xff]  ;;  %s2972_s5 = scalar_lea.vmem %s2342_s25, 128  ;;  %p2977_p1 = scmp.lt.s32.totalorder %s2342_s25, %s2342_s25 }
0x2a0a   :  { %p2973_p0 = scmp.ne.s32.totalorder %s2342_s25, %s2972_s5  ;;  %p2978_p2 = scmp.lt.s32.totalorder %s2972_s5, %s2972_s5 }
0x2a0b   :  { %2055 = vrot.lane.b32.xlu1 %v2050_v24, %s3002_s20 }
0x2a0c   :  { %p2979_p3 = por %p2978_p2, %p2977_p1 }
0x2a0e   :  { %p2980_p4 = pnand %p2979_p3, %p2973_p0 }
0x2a7d   :  { %v2056_v25 = vpop.permute.xlu1 %2055 }
0x2a7e   :  { %2763 = vmatmul.mubr.msk.bf16.vlgmr.msra.gmra.mrb[72].mxu1 %vm247_vm4, %v2056_v25  ;;  %2769 = vmatmul.mubr.msk.bf16.vlgmr.msra.gmra.mrb[60].mxu0 %vm247_vm4, %v2056_v25 }
0x2a7f   :  { %2774 = vmatprep.mubr.msk.bf16.mxu1 %vm2997_vm2, %v2996_v5  ;;  %2810 = vmatprep.mubr.msk.f32.mxu0 %vm2997_vm2, %v2996_v5 }
0x2a80   :  { %2773 = vmatpush3.bf16.msra.mxu1 %v2874_v47  ;;  %2815 = vmatpush3.bf16.msra.mxu0 %v2814_v53 }
0x2a81   :  { %2816 = vmatprep.subr.bf16.mxu0 %v3003_v52 }
0x2a84   :  { %2818 = vmatpush3.bf16.msra.mxu0 %v2817_v55 }
0x2a85   :  { %2819 = vmatprep.subr.bf16.mxu0 %v3003_v52 }
0x2a88   :  { %2821 = vmatpush3.bf16.msra.mxu0 %v2820_v57 }
0x2a89   :  { %2822 = vmatprep.subr.bf16.mxu0 %v3003_v52 }
0x2b51   :  { %v2100_v26 = vpop.f32.mrb[72].mxu1  ;;  %v2142_v28 = vpop.f32.mrb[60].mxu0 }
0x2b52   :  { %v3388_v29 = vadd.f32 %v2100_v26, %v1982_v9  ;;  %v2148_v30 = vadd.f32 %v2142_v28, %v2107_v27  ;;  %v2764_v31 = vpop.f32.mrb[73].mxu1  ;;  %v2770_v32 = vpop.f32.mrb[61].mxu0  ;;  %v2823_v9 = vpack.c.bf16 %v2247_v60, %v2246_v59 }
0x2b53   :  { %v2103_v33 = vpop.f32.mrb[74].mxu1  ;;  %v2145_v34 = vpop.f32.mrb[62].mxu0 }
0x2b54   :  { %v2470_v35 = vmul.f32 -1.442695, %v2148_v30  ;;  %v2765_v36 = vpop.f32.mrb[75].mxu1  ;;  %v2771_v37 = vpop.f32.mrb[63].mxu0  ;;  %2824 = vmatpush3.bf16.msra.mxu0 %v2823_v9 }
0x2b55   :  { %2825 = vmatprep.subr.bf16.mxu0 %v3003_v52 }
0x2b56   :  { %2965 = vpow2.f32 %v2470_v35 }
0x2b58   :  { %2827 = vmatpush3.bf16.msra.mxu0 %v2826_v1 }
0x2b59   :  { %2828 = vmatprep.subr.bf16.mxu0 %v3003_v52 }
0x2b5c   :  { %2830 = vmatpush3.bf16.msra.mxu0 %v2829_v4 }
0x2b5d   :  { %2831 = vmatprep.subr.bf16.mxu0 %v3003_v52 }
0x2b60   :  { %v2966_v38 = vpop.eup %2965  ;;  %2833 = vmatpush3.bf16.msra.mxu0 %v2832_v11 }
0x2b61   :  { %v2152_v39 = vadd.f32 1.0, %v2966_v38  ;;  %2834 = vmatprep.subr.bf16.mxu0 %v3003_v52 }
0x2b63   :  { %2967 = vrcp.f32 %v2152_v39 }
0x2b64   :  { %2836 = vmatpush3.bf16.msra.mxu0 %v2835_v14 }
0x2b6d   :  { %v2968_v40 = vpop.eup %2967 }
0x2b6e   :  { %v2155_v41 = vmul.f32 2.0, %v2968_v40  ;;  %v2157_v44 = vmul.f32 %v2968_v40, %v2043_v20 }
0x2b70   :  { %v2471_v5 = vadd.f32 -1.0, %v2155_v41 }
0x2b72   :  { %2159 = vrot.lane.b32.xlu0 %v2471_v5, %s2999_s3 }
0x2be4   :  { %v2160_v42 = vpop.permute.xlu0 %2159 }
0x2be5   :  { %v2162_v43 = vmul.f32 %v2968_v40, %v2160_v42 }
0x2be7   :  { %2164 = vrot.lane.b32.xlu1 %v2162_v43, %s3000_s18 }
0x2c59   :  { %v2165_v45 = vpop.permute.xlu1 %2164 }
0x2c5a   :  { %v2167_v46 = vadd.f32 %v2165_v45, %v2157_v44 }
0x2c5c   :  { %2969 = vtanh.f32 %v2167_v46 }
0x2c66   :  { %v2970_v48 = vpop.eup %2969 }
0x2c67   :  { %2170 = vrot.lane.b32.xlu0 %v2970_v48, %s3001_s19 }
0x2cd9   :  { %v2171_v58 = vpop.permute.xlu0 %2170 }
0x2cda   :  { %v2173_v61 = vmul.f32 %v2968_v40, %v2171_v58 }
0x2cdc   :  { %v2174_v62 = vpack.c.bf16 %v2173_v61, %v2173_v61 }
0x2cde   :  { %2179 = vrot.lane.b32.xlu1 %v2174_v62, %s3002_s20 }
0x2d50   :  { %v2180_v6 = vpop.permute.xlu1 %2179 }
0x2d51   :  { %2775 = vmatmul.mubr.msk.bf16.vlgmr.msra.gmra.mrb[76].mxu1 %vm247_vm4, %v2180_v6 }
0x2e24   :  { %v2224_v15 = vpop.f32.mrb[76].mxu1 }
0x2e25   :  { %v2230_v18 = vadd.f32 %v2224_v15, %v3388_v29  ;;  %v2776_v19 = vpop.f32.mrb[77].mxu1 }
0x2e26   :  { %v2227_v20 = vpop.f32.mrb[78].mxu1 }
0x2e27   :  { %v2238_v16 = vadd.f32 %v2476_v17, %v2230_v18  ;;  %v2777_v21 = vpop.f32.mrb[79].mxu1 }
0x2e29   :  { %v2239_v22 = vmax.f32 %v2238_v16, 0.0 }
0x2e2b   :  { %2811 = vmatmul.mubr.f32.vlgmr.msra.gmra.mrb[64].mxu0 %v2239_v22 }
0x2efe   :  { %v2329_v24 = vpop.f32.mrb[64].mxu0 }
0x2eff   :  { %v2330_v25 = vadd.f32 %v2477_v23, %v2329_v24  ;;  %v2812_v26 = vpop.f32.mrb[65].mxu0 }
0x2f01   :  { %2334 = vst.msk [vmem:[#allocation3] sm:$0xff] %vm2333_vm5, %v2330_v25 }
0x2f02   :  { %2983 = shalt.err (!%p2980_p4)
}
0x2f03   :  { %s2984_s28 = scalar_lea.hbm %s3473_s8, 128 }
0x2f04   :  { %p2985_p5 = scmp.ne.s32.totalorder %s3473_s8, %s2984_s28  ;;  %p2988_p6 = scmp.lt.u32.totalorder %s2984_s28, %s3473_s8 }
0x2f06   :  { %p2990_p7 = pnand %p2988_p6, %p2985_p5 }
0x2f08   :  { %2993 = shalt.err (!%p2990_p7)
}
0x2f09   :  { %2344 = dma.vmem_to_hbm [thread:$0]  %s2342_s25, 128, %s3473_s8, [#allocation4]  }
0x2f0a   :  { %2994 = dma.done.wait [#allocation4], 128  }
0x2f0b   :  { %2995 = vsyncadd [#allocation4], 4294967168 }
0x2f0c   :  { %2348 = vsyncpa [#allocation4], 1 }

</bundles_post_ra>
